<compile_context>
chip_gen: v6e
topology: v6e:2x2x1
jax: 0.10.0
libtpu: 0.0.40
codegen_flags: <defaults>
</compile_context>

<pallas_src>
import numpy as np

import jax
import jax.numpy as jnp
from jax import lax
from jax.experimental import pallas as pl
from jax.experimental.pallas import tpu as pltpu


# --------------------------------------------------------------------------
# Synthetic "YAML" config (stride is 1 everywhere; see TODO below).
# --------------------------------------------------------------------------
CONFIG = {
    "input_channels": 4,
    "num_classes": 10,
    "conv_layers": [
        {"out_channels": 8, "kernel_size": 3, "stride": 1, "padding": 1,
         "batch_norm": True, "max_pool": True},
        {"out_channels": 16, "kernel_size": 3, "stride": 1, "padding": 1,
         "batch_norm": False, "max_pool": True},
    ],
    "fc_layers": [32],
}

_BN_EPS = 1e-5


def _full_spec(shape):
    # Whole array as a single block (grid=(1,)), resident in VMEM.
    return pl.BlockSpec(shape, lambda i: (0,) * len(shape))


def _round_up(x, m):
    return -(-x // m) * m


# --------------------------------------------------------------------------
# Parameter preprocessing (host-side, one time)
# --------------------------------------------------------------------------
def _conv_band(w_oihw, w_in, pad, in_lane, in_lanes_pad):
    """Merged-kh band weight of a stride-1 conv.

    Row index = kh * in_lanes_pad + in_lane(w_in_logical, c_in); column index =
    w_out * Cout + c_out.  The (kw, cin) contraction and W zero padding are
    folded in; rows of dead / alignment-pad lanes stay zero."""
    cout, cin, k, kw_n = w_oihw.shape
    w_out = w_in + 2 * pad - kw_n + 1
    band = np.zeros((k * in_lanes_pad, w_out * cout), np.float32)
    for kh in range(k):
        for wo in range(w_out):
            for kw in range(kw_n):
                wi = wo + kw - pad
                if 0 <= wi < w_in:
                    for c_in in range(cin):
                        band[kh * in_lanes_pad + in_lane(wi, c_in),
                             wo * cout:(wo + 1) * cout] = w_oihw[:, c_in, kh, kw]
    return band


def init_params(key, config, spatial, batch):
    """Deterministic synthetic parameters in torch layout (for the pure-JAX
    reference) and pre-transformed into the layouts the fused kernel consumes."""
    conv_meta, kernel_args = [], []
    raw_convs, raw_fcs = [], []

    cin = config["input_channels"]
    H = W = spatial
    # Lane packing of the activation feeding the next conv layer / FC flatten:
    #   layer-1 input (straight from NCHW, no transpose): lane = c * W + w
    #   conv outputs: lane = w * Cout + c; a roll-pool leaves lane = (2*w)*Cout + c
    in_lanes = cin * W
    in_lane = (lambda w, c, _W=W: c * _W + w)

    for layer in config["conv_layers"]:
        cout, k = layer["out_channels"], layer["kernel_size"]
        stride, pad = layer["stride"], layer["padding"]
        # TODO(synk): only stride=1 convolutions are implemented (config uses stride=1).
        assert stride == 1, "only stride=1 supported"
        key, k_w, k_b = jax.random.split(key, 3)
        w_oihw = np.asarray(jax.random.normal(k_w, (cout, cin, k, k), jnp.float32)) \
            / np.sqrt(cin * k * k)
        bias = np.asarray(jax.random.normal(k_b, (cout,), jnp.float32)) * 0.05
        raw_convs.append(dict(w=w_oihw, b=bias))

        H_out = H + 2 * pad - k + 1
        W_out = W + 2 * pad - k + 1
        use_bn = layer.get("batch_norm", False)
        use_pool = layer.get("max_pool", False)
        in_lanes_pad = _round_up(in_lanes, 128)   # keeps lane-concat pieces aligned
        out_lanes = W_out * cout

        kernel_args.append(jnp.asarray(
            _conv_band(w_oihw, W, pad, in_lane, in_lanes_pad), jnp.bfloat16))
        kernel_args.append(jnp.asarray(np.tile(bias, W_out)[None, :], jnp.float32))
        if use_bn:  # BatchNorm2d defaults: gamma=1, beta=0, training-mode batch stats.
            kernel_args.append(jnp.asarray(
                np.tile(np.ones(cout, np.float32), W_out)[None, :]))
            kernel_args.append(jnp.asarray(
                np.tile(np.zeros(cout, np.float32), W_out)[None, :]))
            # Host-precomputed per-channel averaging matrix (1/count baked in):
            #   [mean; E[x^2]] = [sum(y); sum(y*y)] @ avg
            lane_ch = np.arange(out_lanes) % cout
            avg = (lane_ch[:, None] == lane_ch[None, :]).astype(np.float32) \
                / float(batch * H_out * W_out)
            kernel_args.append(jnp.asarray(avg, jnp.float32))

        conv_meta.append(dict(cin=cin, cout=cout, k=k, pad=pad,
                              H_in=H, W_in=W, H_out=H_out, W_out=W_out,
                              in_lanes=in_lanes, in_lanes_pad=in_lanes_pad,
                              out_lanes=out_lanes,
                              use_bn=use_bn, use_pool=use_pool))
        H, W, cin = H_out, W_out, cout
        if use_pool:
            assert H % 2 == 0 and W % 2 == 0, "2x2/2 max-pool needs even H, W"
            H, W = H // 2, W // 2
            # roll-pool keeps the pre-pool lane width; valid data at even w slots
            in_lanes = out_lanes
            in_lane = (lambda w, c, _C=cout: (2 * w) * _C + c)
        else:
            in_lanes = out_lanes
            in_lane = (lambda w, c, _C=cout: w * _C + c)

    H_f, W_f, C_f = H, W, cin
    flat_kernel = H_f * in_lanes          # kernel flatten width (incl. dead lanes)
    flat_torch = C_f * H_f * W_f          # torch NCHW flatten width
    fc_meta = []
    in_f = flat_torch
    fc_sizes = list(config["fc_layers"]) + [config["num_classes"]]
    for i, out_f in enumerate(fc_sizes):
        key, k_w, k_b = jax.random.split(key, 3)
        w_torch = np.asarray(jax.random.normal(k_w, (out_f, in_f), jnp.float32)) \
            / np.sqrt(in_f)
        bias = np.asarray(jax.random.normal(k_b, (out_f,), jnp.float32)) * 0.05
        raw_fcs.append(dict(w=w_torch, b=bias))
        w_io = w_torch.T                   # (in_f, out_f)
        if i == 0:
            # Fold torch's NCHW flatten order AND the dead odd-w pool lanes into
            # FC1's row permutation / zero rows (no runtime transpose or repack).
            wk = np.zeros((flat_kernel, out_f), np.float32)
            for c in range(C_f):
                for hh in range(H_f):
                    for ww in range(W_f):
                        wk[hh * in_lanes + in_lane(ww, c), :] = \
                            w_io[c * (H_f * W_f) + hh * W_f + ww, :]
            w_io = wk
        kernel_args.append(jnp.asarray(w_io, jnp.bfloat16))
        kernel_args.append(jnp.asarray(bias[None, :], jnp.float32))
        fc_meta.append(dict(out_f=out_f, relu=(i < len(fc_sizes) - 1)))
        in_f = out_f

    raw = dict(convs=raw_convs, fcs=raw_fcs)
    return conv_meta, fc_meta, kernel_args, raw


# --------------------------------------------------------------------------
# Fused kernel
# --------------------------------------------------------------------------
def make_fused_kernel(conv_meta, fc_meta, N):
    n_conv_args = sum(5 if m["use_bn"] else 2 for m in conv_meta)
    n_fc_args = 2 * len(fc_meta)

    def kernel(*refs):
        x_ref = refs[0]                                    # (N, Cin0*H0, W0) f32 (NCHW view)
        conv_refs = refs[1:1 + n_conv_args]
        fc_refs = refs[1 + n_conv_args:1 + n_conv_args + n_fc_args]
        out_ref = refs[1 + n_conv_args + n_fc_args]
        pad_refs = refs[2 + n_conv_args + n_fc_args:]      # one padded-input scratch per conv

        a = None
        cur = 0
        for li, m in enumerate(conv_meta):
            w_ref, b_ref = conv_refs[cur], conv_refs[cur + 1]
            cur += 2
            if m["use_bn"]:
                g_ref, beta_ref, avg_ref = (conv_refs[cur], conv_refs[cur + 1],
                                            conv_refs[cur + 2])
                cur += 3
            k, pad = m["k"], m["pad"]
            H_in, W_in, H_out = m["H_in"], m["W_in"], m["H_out"]
            in_lanes, in_lanes_pad = m["in_lanes"], m["in_lanes_pad"]
            out_lanes, Cout = m["out_lanes"], m["cout"]

            # H-padded staging buffer: zero ONLY the pad edge rows and the
            # lane-alignment pad columns; write the interior exactly once.
            xp = pad_refs[li]                              # (N, H_in+2*pad, in_lanes_pad) f32
            if pad:
                xp[:, 0:pad, :] = jnp.zeros((N, pad, in_lanes_pad), jnp.float32)
                xp[:, pad + H_in:pad + H_in + pad, :] = \
                    jnp.zeros((N, pad, in_lanes_pad), jnp.float32)
            if in_lanes_pad > in_lanes:
                xp[:, :, in_lanes:in_lanes_pad] = jnp.zeros(
                    (N, H_in + 2 * pad, in_lanes_pad - in_lanes), jnp.float32)
            if li == 0:
                # In-kernel NCHW -> (N, H, Cin*W) relayout (lane = c*W + w); the
                # wrapper only does a free contiguous reshape, no XLA transpose.
                x = x_ref[...]                             # (N, Cin*H, W)
                for c in range(m["cin"]):
                    xp[:, pad:pad + H_in, c * W_in:(c + 1) * W_in] = \
                        x[:, c * H_in:(c + 1) * H_in, :]
            else:
                xp[:, pad:pad + H_in, 0:in_lanes] = a

            # im2col along H: lane-concat the k row-shifted windows (128-aligned
            # pieces) -> one slab, ONE bf16 MXU dot per conv layer (cast hoisted
            # to a single astype per layer), f32 accumulation.
            slab = jnp.concatenate(
                [xp[:, kh:kh + H_out, :] for kh in range(k)],
                axis=-1).reshape(N * H_out, k * in_lanes_pad)
            y = jnp.dot(slab.astype(jnp.bfloat16), w_ref[...],
                        preferred_element_type=jnp.float32) + b_ref[...]

            if m["use_bn"]:
                # TODO(synk): training-mode BatchNorm (per-batch stats, biased
                # variance), matching nn.BatchNorm2d's default mode; eval-mode
                # running stats are not implemented.
                s = jnp.concatenate(
                    [jnp.sum(y, axis=0, keepdims=True),
                     jnp.sum(y * y, axis=0, keepdims=True)], axis=0)   # (2, lanes)
                ms = jnp.dot(s, avg_ref[...], preferred_element_type=jnp.float32)
                mean, ex2 = ms[0:1, :], ms[1:2, :]
                var = jnp.maximum(ex2 - mean * mean, 0.0)
                scale = g_ref[...] * lax.rsqrt(var + _BN_EPS)
                y = y * scale + (beta_ref[...] - mean * scale)

            y = jnp.maximum(y, 0.0)                                    # ReLU (f32)

            if m["use_pool"]:
                # 2x2/2 max-pool: H via a row-pair max; W via one lane roll + max
                # (valid at even-w lanes; the dead odd-w lanes are matched by
                # zero rows in the next conv band / FC1 weight).
                Hh = H_out // 2
                t = jnp.max(y.reshape(N, Hh, 2, out_lanes), axis=2)
                t = t.reshape(N * Hh, out_lanes)
                t = jnp.maximum(t, pltpu.roll(t, out_lanes - Cout, axis=1))
                a = t.reshape(N, Hh, out_lanes)
            else:
                a = y.reshape(N, H_out, out_lanes)

        # Flatten; torch's NCHW flatten order (and the dead pool lanes) are folded
        # into FC1's row permutation at init.
        h = a.reshape(N, -1)
        for i, fm in enumerate(fc_meta):
            w_ref, b_ref = fc_refs[2 * i], fc_refs[2 * i + 1]
            h = jnp.dot(h.astype(jnp.bfloat16), w_ref[...],
                        preferred_element_type=jnp.float32) + b_ref[...]
            if fm["relu"]:
                h = jnp.maximum(h, 0.0)
        out_ref[...] = h

    return kernel


def make_forward(config, spatial, batch, key):
    conv_meta, fc_meta, params, raw = init_params(key, config, spatial, batch)
    N = batch
    H0 = W0 = spatial
    Cin0 = config["input_channels"]
    num_classes = config["num_classes"]

    kernel = make_fused_kernel(conv_meta, fc_meta, N)
    in_shapes = [(N, Cin0 * H0, W0)] + [tuple(p.shape) for p in params]
    scratch = [pltpu.VMEM((N, m["H_in"] + 2 * m["pad"], m["in_lanes_pad"]), jnp.float32)
               for m in conv_meta]

    fused_call = pl.pallas_call(
        kernel,
        grid=(1,),
        in_specs=[_full_spec(s) for s in in_shapes],
        out_specs=_full_spec((N, num_classes)),
        out_shape=jax.ShapeDtypeStruct((N, num_classes), jnp.float32),
        scratch_shapes=scratch,
        # TODO(synk): single grid step at N=2 (whole net fits one VMEM tile). A
        # production batch should become a leading 'parallel' grid axis (BlockSpec
        # over N, ~2x on v7x megacore) -- which then needs cross-core BN stats --
        # with tile sizes re-derived against v7x's 64 MiB VMEM.
        compiler_params=pltpu.CompilerParams(dimension_semantics=("arbitrary",)),
    )

    @jax.jit
    def forward(x_nchw):
        # Contiguous (N, C, H, W) -> (N, C*H, W) view (free reshape, no copy); the
        # NCHW -> lane-packed relayout itself happens inside the kernel.
        x3 = x_nchw.astype(jnp.float32).reshape(N, Cin0 * H0, W0)
        return fused_call(x3, *params)

    @jax.jit
    def reference(x_nchw):
        # Pure-JAX f32 reference with torch semantics (train-mode BN, NCHW flatten).
        x = x_nchw.astype(jnp.float32)
        for layer_cfg, p in zip(config["conv_layers"], raw["convs"]):
            w, b = jnp.asarray(p["w"]), jnp.asarray(p["b"])
            pad = layer_cfg["padding"]
            x = lax.conv_general_dilated(
                x, w, (layer_cfg["stride"],) * 2, [(pad, pad), (pad, pad)],
                dimension_numbers=("NCHW", "OIHW", "NCHW"))
            x = x + b[None, :, None, None]
            if layer_cfg.get("batch_norm", False):
                mean = jnp.mean(x, axis=(0, 2, 3), keepdims=True)
                var = jnp.mean((x - mean) ** 2, axis=(0, 2, 3), keepdims=True)
                x = (x - mean) * lax.rsqrt(var + _BN_EPS)   # gamma=1, beta=0
            x = jnp.maximum(x, 0.0)
            if layer_cfg.get("max_pool", False):
                x = lax.reduce_window(x, -jnp.inf, lax.max,
                                      (1, 1, 2, 2), (1, 1, 2, 2), "VALID")
        x = x.reshape(x.shape[0], -1)
        for i, p in enumerate(raw["fcs"]):
            x = x @ jnp.asarray(p["w"]).T + jnp.asarray(p["b"])
            if i < len(raw["fcs"]) - 1:
                x = jnp.maximum(x, 0.0)
        return x

    return forward, reference


if __name__ == "__main__":
    key = jax.random.PRNGKey(0)
    k_param, k_x = jax.random.split(key)
    BATCH, SPATIAL = 2, 16
    # NOTE: the torch module sizes its flatten against hard-coded 28x28 inputs;
    # here flat_size is derived from the actual (small) 16x16 input instead.
    forward, reference = make_forward(CONFIG, SPATIAL, BATCH, k_param)
    x = jax.random.normal(k_x, (BATCH, CONFIG["input_channels"], SPATIAL, SPATIAL),
                          jnp.float32)
    out = forward(x)
    jax.block_until_ready(out)
    assert out.shape == (BATCH, CONFIG["num_classes"]), out.shape
    assert bool(jnp.all(jnp.isfinite(out))), "non-finite output"
    # Parity vs. pure-JAX f32 reference (tolerance covers bf16 MXU operands).
    ref = reference(x)
    np.testing.assert_allclose(np.asarray(out), np.asarray(ref), rtol=5e-2, atol=5e-2)
    print("KERNEL_OK")
</pallas_src>

<mosaic_0001>
module attributes {stable_mosaic.version = 11 : i64} {
  func.func @kernel(%arg0: i32, %arg1: memref<2x64x16xf32, #tpu.memory_space<vmem>>, %arg2: memref<384x128xbf16, #tpu.memory_space<vmem>>, %arg3: memref<1x128xf32, #tpu.memory_space<vmem>>, %arg4: memref<1x128xf32, #tpu.memory_space<vmem>>, %arg5: memref<1x128xf32, #tpu.memory_space<vmem>>, %arg6: memref<128x128xf32, #tpu.memory_space<vmem>>, %arg7: memref<384x128xbf16, #tpu.memory_space<vmem>>, %arg8: memref<1x128xf32, #tpu.memory_space<vmem>>, %arg9: memref<512x32xbf16, #tpu.memory_space<vmem>>, %arg10: memref<1x32xf32, #tpu.memory_space<vmem>>, %arg11: memref<32x10xbf16, #tpu.memory_space<vmem>>, %arg12: memref<1x10xf32, #tpu.memory_space<vmem>>, %arg13: memref<2x10xf32, #tpu.memory_space<vmem>>, %arg14: memref<2x18x128xf32, #tpu.memory_space<vmem>>, %arg15: memref<2x10x128xf32, #tpu.memory_space<vmem>>) attributes {dimension_semantics = [#tpu.dimension_semantics<arbitrary>], iteration_bounds = array<i64: 1>, scalar_prefetch = 0 : i64, scratch_operands = 2 : i64, tpu.core_type = #tpu.core_type<tc>, window_params = [{pipeline_mode = #tpu.pipeline_mode<synchronous>, transform_indices = @transform_0, window_bounds = array<i64: 2, 64, 16>}, {pipeline_mode = #tpu.pipeline_mode<synchronous>, transform_indices = @transform_1, window_bounds = array<i64: 384, 128>}, {pipeline_mode = #tpu.pipeline_mode<synchronous>, transform_indices = @transform_2, window_bounds = array<i64: 1, 128>}, {pipeline_mode = #tpu.pipeline_mode<synchronous>, transform_indices = @transform_3, window_bounds = array<i64: 1, 128>}, {pipeline_mode = #tpu.pipeline_mode<synchronous>, transform_indices = @transform_4, window_bounds = array<i64: 1, 128>}, {pipeline_mode = #tpu.pipeline_mode<synchronous>, transform_indices = @transform_5, window_bounds = array<i64: 128, 128>}, {pipeline_mode = #tpu.pipeline_mode<synchronous>, transform_indices = @transform_6, window_bounds = array<i64: 384, 128>}, {pipeline_mode = #tpu.pipeline_mode<synchronous>, transform_indices = @transform_7, window_bounds = array<i64: 1, 128>}, {pipeline_mode = #tpu.pipeline_mode<synchronous>, transform_indices = @transform_8, window_bounds = array<i64: 512, 32>}, {pipeline_mode = #tpu.pipeline_mode<synchronous>, transform_indices = @transform_9, window_bounds = array<i64: 1, 32>}, {pipeline_mode = #tpu.pipeline_mode<synchronous>, transform_indices = @transform_10, window_bounds = array<i64: 32, 10>}, {pipeline_mode = #tpu.pipeline_mode<synchronous>, transform_indices = @transform_11, window_bounds = array<i64: 1, 10>}, {pipeline_mode = #tpu.pipeline_mode<synchronous>, transform_indices = @transform_12, window_bounds = array<i64: 2, 10>}]} {
    %cst = arith.constant 0.000000e+00 : f32
    %0 = vector.broadcast %cst : f32 to vector<2x1x128xf32>
    %c0 = arith.constant 0 : index
    %c0_0 = arith.constant 0 : index
    %c0_1 = arith.constant 0 : index
    %1 = vector.load %arg14[%c0, %c0_0, %c0_1] : memref<2x18x128xf32, #tpu.memory_space<vmem>>, vector<2x1x128xf32>
    tpu.vector_store %arg14[%c0, %c0_0, %c0_1], %0 {strides = array<i32>} : memref<2x18x128xf32, #tpu.memory_space<vmem>>, vector<2x1x128xf32>,
    %cst_2 = arith.constant 0.000000e+00 : f32
    %2 = vector.broadcast %cst_2 : f32 to vector<2x1x128xf32>
    %c0_3 = arith.constant 0 : index
    %c17 = arith.constant 17 : index
    %c0_4 = arith.constant 0 : index
    %3 = vector.load %arg14[%c0_3, %c17, %c0_4] : memref<2x18x128xf32, #tpu.memory_space<vmem>>, vector<2x1x128xf32>
    tpu.vector_store %arg14[%c0_3, %c17, %c0_4], %2 {strides = array<i32>} : memref<2x18x128xf32, #tpu.memory_space<vmem>>, vector<2x1x128xf32>,
    %cst_5 = arith.constant 0.000000e+00 : f32
    %4 = vector.broadcast %cst_5 : f32 to vector<2x18x64xf32>
    %c0_6 = arith.constant 0 : index
    %c0_7 = arith.constant 0 : index
    %c64 = arith.constant 64 : index
    %5 = vector.load %arg14[%c0_6, %c0_7, %c64] : memref<2x18x128xf32, #tpu.memory_space<vmem>>, vector<2x18x64xf32>
    tpu.vector_store %arg14[%c0_6, %c0_7, %c64], %4 {strides = array<i32>} : memref<2x18x128xf32, #tpu.memory_space<vmem>>, vector<2x18x64xf32>,
    %c0_8 = arith.constant 0 : index
    %c0_9 = arith.constant 0 : index
    %c0_10 = arith.constant 0 : index
    %6 = vector.load %arg1[%c0_8, %c0_9, %c0_10] : memref<2x64x16xf32, #tpu.memory_space<vmem>>, vector<2x64x16xf32>
    %7 = vector.extract_strided_slice %6 {offsets = [0, 0, 0], sizes = [2, 16, 16], strides = [1, 1, 1]} : vector<2x64x16xf32> to vector<2x16x16xf32>
    %c0_11 = arith.constant 0 : index
    %c1 = arith.constant 1 : index
    %c0_12 = arith.constant 0 : index
    %8 = vector.load %arg14[%c0_11, %c1, %c0_12] : memref<2x18x128xf32, #tpu.memory_space<vmem>>, vector<2x16x16xf32>
    tpu.vector_store %arg14[%c0_11, %c1, %c0_12], %7 {strides = array<i32>} : memref<2x18x128xf32, #tpu.memory_space<vmem>>, vector<2x16x16xf32>,
    %9 = vector.extract_strided_slice %6 {offsets = [0, 16, 0], sizes = [2, 16, 16], strides = [1, 1, 1]} : vector<2x64x16xf32> to vector<2x16x16xf32>
    %c0_13 = arith.constant 0 : index
    %c1_14 = arith.constant 1 : index
    %c16 = arith.constant 16 : index
    %10 = vector.load %arg14[%c0_13, %c1_14, %c16] : memref<2x18x128xf32, #tpu.memory_space<vmem>>, vector<2x16x16xf32>
    tpu.vector_store %arg14[%c0_13, %c1_14, %c16], %9 {strides = array<i32>} : memref<2x18x128xf32, #tpu.memory_space<vmem>>, vector<2x16x16xf32>,
    %11 = vector.extract_strided_slice %6 {offsets = [0, 32, 0], sizes = [2, 16, 16], strides = [1, 1, 1]} : vector<2x64x16xf32> to vector<2x16x16xf32>
    %c0_15 = arith.constant 0 : index
    %c1_16 = arith.constant 1 : index
    %c32 = arith.constant 32 : index
    %12 = vector.load %arg14[%c0_15, %c1_16, %c32] : memref<2x18x128xf32, #tpu.memory_space<vmem>>, vector<2x16x16xf32>
    tpu.vector_store %arg14[%c0_15, %c1_16, %c32], %11 {strides = array<i32>} : memref<2x18x128xf32, #tpu.memory_space<vmem>>, vector<2x16x16xf32>,
    %13 = vector.extract_strided_slice %6 {offsets = [0, 48, 0], sizes = [2, 16, 16], strides = [1, 1, 1]} : vector<2x64x16xf32> to vector<2x16x16xf32>
    %c0_17 = arith.constant 0 : index
    %c1_18 = arith.constant 1 : index
    %c48 = arith.constant 48 : index
    %14 = vector.load %arg14[%c0_17, %c1_18, %c48] : memref<2x18x128xf32, #tpu.memory_space<vmem>>, vector<2x16x16xf32>
    tpu.vector_store %arg14[%c0_17, %c1_18, %c48], %13 {strides = array<i32>} : memref<2x18x128xf32, #tpu.memory_space<vmem>>, vector<2x16x16xf32>,
    %c0_19 = arith.constant 0 : index
    %c0_20 = arith.constant 0 : index
    %c0_21 = arith.constant 0 : index
    %15 = vector.load %arg14[%c0_19, %c0_20, %c0_21] : memref<2x18x128xf32, #tpu.memory_space<vmem>>, vector<2x16x128xf32>
    %c0_22 = arith.constant 0 : index
    %c1_23 = arith.constant 1 : index
    %c0_24 = arith.constant 0 : index
    %16 = vector.load %arg14[%c0_22, %c1_23, %c0_24] : memref<2x18x128xf32, #tpu.memory_space<vmem>>, vector<2x16x128xf32>
    %c0_25 = arith.constant 0 : index
    %c2 = arith.constant 2 : index
    %c0_26 = arith.constant 0 : index
    %17 = vector.load %arg14[%c0_25, %c2, %c0_26] : memref<2x18x128xf32, #tpu.memory_space<vmem>>, vector<2x16x128xf32>
    %18 = tpu.concatenate %15, %16, %17 in 2 : vector<2x16x128xf32>, vector<2x16x128xf32>, vector<2x16x128xf32> -> vector<2x16x384xf32>
    %19 = vector.shape_cast %18 : vector<2x16x384xf32> to vector<32x384xf32>
    %20 = arith.truncf %19 : vector<32x384xf32> to vector<32x384xbf16>
    %c0_27 = arith.constant 0 : index
    %c0_28 = arith.constant 0 : index
    %21 = vector.load %arg2[%c0_27, %c0_28] : memref<384x128xbf16, #tpu.memory_space<vmem>>, vector<384x128xbf16>
    %cst_29 = arith.constant dense<0.000000e+00> : vector<32x128xf32>
    %22 = tpu.matmul %20, %21, %cst_29 {dimension_numbers = #tpu.dot_dimension_numbers<[1], [0], [0], [1], [0, 0, 1, 1], [], []>} : vector<32x384xbf16>, vector<384x128xbf16>, vector<32x128xf32> -> vector<32x128xf32>
    %c0_30 = arith.constant 0 : index
    %c0_31 = arith.constant 0 : index
    %23 = vector.load %arg3[%c0_30, %c0_31] : memref<1x128xf32, #tpu.memory_space<vmem>>, vector<1x128xf32>
    %24 = vector.broadcast %23 : vector<1x128xf32> to vector<32x128xf32>
    %25 = arith.addf %22, %24 : vector<32x128xf32>
    %cst_32 = arith.constant dense<0.000000e+00> : vector<128xf32>
    %26 = vector.multi_reduction <add>, %25, %cst_32 [0] : vector<32x128xf32> to vector<128xf32>
    %27 = vector.shape_cast %26 : vector<128xf32> to vector<1x128xf32>
    %28 = arith.mulf %25, %25 : vector<32x128xf32>
    %cst_33 = arith.constant dense<0.000000e+00> : vector<128xf32>
    %29 = vector.multi_reduction <add>, %28, %cst_33 [0] : vector<32x128xf32> to vector<128xf32>
    %30 = vector.shape_cast %29 : vector<128xf32> to vector<1x128xf32>
    %31 = tpu.concatenate %27, %30 in 0 : vector<1x128xf32>, vector<1x128xf32> -> vector<2x128xf32>
    %c0_34 = arith.constant 0 : index
    %c0_35 = arith.constant 0 : index
    %32 = vector.load %arg6[%c0_34, %c0_35] : memref<128x128xf32, #tpu.memory_space<vmem>>, vector<128x128xf32>
    %cst_36 = arith.constant dense<0.000000e+00> : vector<2x128xf32>
    %33 = tpu.matmul %31, %32, %cst_36 {dimension_numbers = #tpu.dot_dimension_numbers<[1], [0], [0], [1], [0, 0, 1, 1], [], []>} : vector<2x128xf32>, vector<128x128xf32>, vector<2x128xf32> -> vector<2x128xf32>
    %34 = vector.extract_strided_slice %33 {offsets = [0, 0], sizes = [1, 128], strides = [1, 1]} : vector<2x128xf32> to vector<1x128xf32>
    %35 = vector.extract_strided_slice %33 {offsets = [1, 0], sizes = [1, 128], strides = [1, 1]} : vector<2x128xf32> to vector<1x128xf32>
    %36 = arith.mulf %34, %34 : vector<1x128xf32>
    %37 = arith.subf %35, %36 : vector<1x128xf32>
    %cst_37 = arith.constant 0.000000e+00 : f32
    %38 = vector.broadcast %cst_37 : f32 to vector<1x128xf32>
    %39 = arith.maximumf %37, %38 : vector<1x128xf32>
    %c0_38 = arith.constant 0 : index
    %c0_39 = arith.constant 0 : index
    %40 = vector.load %arg4[%c0_38, %c0_39] : memref<1x128xf32, #tpu.memory_space<vmem>>, vector<1x128xf32>
    %cst_40 = arith.constant 9.99999974E-6 : f32
    %41 = vector.broadcast %cst_40 : f32 to vector<1x128xf32>
    %42 = arith.addf %39, %41 : vector<1x128xf32>
    %43 = math.rsqrt %42 : vector<1x128xf32>
    %44 = arith.mulf %40, %43 : vector<1x128xf32>
    %45 = vector.broadcast %44 : vector<1x128xf32> to vector<32x128xf32>
    %46 = arith.mulf %25, %45 : vector<32x128xf32>
    %c0_41 = arith.constant 0 : index
    %c0_42 = arith.constant 0 : index
    %47 = vector.load %arg5[%c0_41, %c0_42] : memref<1x128xf32, #tpu.memory_space<vmem>>, vector<1x128xf32>
    %48 = arith.mulf %34, %44 : vector<1x128xf32>
    %49 = arith.subf %47, %48 : vector<1x128xf32>
    %50 = vector.broadcast %49 : vector<1x128xf32> to vector<32x128xf32>
    %51 = arith.addf %46, %50 : vector<32x128xf32>
    %cst_43 = arith.constant 0.000000e+00 : f32
    %52 = vector.broadcast %cst_43 : f32 to vector<32x128xf32>
    %53 = arith.maximumf %51, %52 : vector<32x128xf32>
    %54 = vector.shape_cast %53 : vector<32x128xf32> to vector<2x8x2x128xf32>
    %cst_44 = arith.constant dense<0xFF800000> : vector<2x8x128xf32>
    %55 = vector.multi_reduction <maximumf>, %54, %cst_44 [2] : vector<2x8x2x128xf32> to vector<2x8x128xf32>
    %56 = vector.shape_cast %55 : vector<2x8x128xf32> to vector<16x128xf32>
    %c120_i32 = arith.constant 120 : i32
    %57 = tpu.dynamic_rotate %56 by %c120_i32 dim 1 : vector<16x128xf32>, i32 -> vector<16x128xf32>
    %58 = arith.maximumf %56, %57 : vector<16x128xf32>
    %59 = vector.shape_cast %58 : vector<16x128xf32> to vector<2x8x128xf32>
    %cst_45 = arith.constant 0.000000e+00 : f32
    %60 = vector.broadcast %cst_45 : f32 to vector<2x1x128xf32>
    %c0_46 = arith.constant 0 : index
    %c0_47 = arith.constant 0 : index
    %c0_48 = arith.constant 0 : index
    %61 = vector.load %arg15[%c0_46, %c0_47, %c0_48] : memref<2x10x128xf32, #tpu.memory_space<vmem>>, vector<2x1x128xf32>
    tpu.vector_store %arg15[%c0_46, %c0_47, %c0_48], %60 {strides = array<i32>} : memref<2x10x128xf32, #tpu.memory_space<vmem>>, vector<2x1x128xf32>,
    %cst_49 = arith.constant 0.000000e+00 : f32
    %62 = vector.broadcast %cst_49 : f32 to vector<2x1x128xf32>
    %c0_50 = arith.constant 0 : index
    %c9 = arith.constant 9 : index
    %c0_51 = arith.constant 0 : index
    %63 = vector.load %arg15[%c0_50, %c9, %c0_51] : memref<2x10x128xf32, #tpu.memory_space<vmem>>, vector<2x1x128xf32>
    tpu.vector_store %arg15[%c0_50, %c9, %c0_51], %62 {strides = array<i32>} : memref<2x10x128xf32, #tpu.memory_space<vmem>>, vector<2x1x128xf32>,
    %c0_52 = arith.constant 0 : index
    %c1_53 = arith.constant 1 : index
    %c0_54 = arith.constant 0 : index
    %64 = vector.load %arg15[%c0_52, %c1_53, %c0_54] : memref<2x10x128xf32, #tpu.memory_space<vmem>>, vector<2x8x128xf32>
    tpu.vector_store %arg15[%c0_52, %c1_53, %c0_54], %59 {strides = array<i32>} : memref<2x10x128xf32, #tpu.memory_space<vmem>>, vector<2x8x128xf32>,
    %c0_55 = arith.constant 0 : index
    %c0_56 = arith.constant 0 : index
    %c0_57 = arith.constant 0 : index
    %65 = vector.load %arg15[%c0_55, %c0_56, %c0_57] : memref<2x10x128xf32, #tpu.memory_space<vmem>>, vector<2x8x128xf32>
    %c0_58 = arith.constant 0 : index
    %c1_59 = arith.constant 1 : index
    %c0_60 = arith.constant 0 : index
    %66 = vector.load %arg15[%c0_58, %c1_59, %c0_60] : memref<2x10x128xf32, #tpu.memory_space<vmem>>, vector<2x8x128xf32>
    %c0_61 = arith.constant 0 : index
    %c2_62 = arith.constant 2 : index
    %c0_63 = arith.constant 0 : index
    %67 = vector.load %arg15[%c0_61, %c2_62, %c0_63] : memref<2x10x128xf32, #tpu.memory_space<vmem>>, vector<2x8x128xf32>
    %68 = tpu.concatenate %65, %66, %67 in 2 : vector<2x8x128xf32>, vector<2x8x128xf32>, vector<2x8x128xf32> -> vector<2x8x384xf32>
    %69 = vector.shape_cast %68 : vector<2x8x384xf32> to vector<16x384xf32>
    %70 = arith.truncf %69 : vector<16x384xf32> to vector<16x384xbf16>
    %c0_64 = arith.constant 0 : index
    %c0_65 = arith.constant 0 : index
    %71 = vector.load %arg7[%c0_64, %c0_65] : memref<384x128xbf16, #tpu.memory_space<vmem>>, vector<384x128xbf16>
    %cst_66 = arith.constant dense<0.000000e+00> : vector<16x128xf32>
    %72 = tpu.matmul %70, %71, %cst_66 {dimension_numbers = #tpu.dot_dimension_numbers<[1], [0], [0], [1], [0, 0, 1, 1], [], []>} : vector<16x384xbf16>, vector<384x128xbf16>, vector<16x128xf32> -> vector<16x128xf32>
    %c0_67 = arith.constant 0 : index
    %c0_68 = arith.constant 0 : index
    %73 = vector.load %arg8[%c0_67, %c0_68] : memref<1x128xf32, #tpu.memory_space<vmem>>, vector<1x128xf32>
    %74 = vector.broadcast %73 : vector<1x128xf32> to vector<16x128xf32>
    %75 = arith.addf %72, %74 : vector<16x128xf32>
    %cst_69 = arith.constant 0.000000e+00 : f32
    %76 = vector.broadcast %cst_69 : f32 to vector<16x128xf32>
    %77 = arith.maximumf %75, %76 : vector<16x128xf32>
    %78 = vector.shape_cast %77 : vector<16x128xf32> to vector<2x4x2x128xf32>
    %cst_70 = arith.constant dense<0xFF800000> : vector<2x4x128xf32>
    %79 = vector.multi_reduction <maximumf>, %78, %cst_70 [2] : vector<2x4x2x128xf32> to vector<2x4x128xf32>
    %80 = vector.shape_cast %79 : vector<2x4x128xf32> to vector<8x128xf32>
    %c112_i32 = arith.constant 112 : i32
    %81 = tpu.dynamic_rotate %80 by %c112_i32 dim 1 : vector<8x128xf32>, i32 -> vector<8x128xf32>
    %82 = arith.maximumf %80, %81 : vector<8x128xf32>
    %83 = vector.shape_cast %82 : vector<8x128xf32> to vector<2x4x128xf32>
    %84 = vector.shape_cast %83 : vector<2x4x128xf32> to vector<2x512xf32>
    %85 = arith.truncf %84 : vector<2x512xf32> to vector<2x512xbf16>
    %c0_71 = arith.constant 0 : index
    %c0_72 = arith.constant 0 : index
    %86 = vector.load %arg9[%c0_71, %c0_72] : memref<512x32xbf16, #tpu.memory_space<vmem>>, vector<512x32xbf16>
    %cst_73 = arith.constant dense<0.000000e+00> : vector<2x32xf32>
    %87 = tpu.matmul %85, %86, %cst_73 {dimension_numbers = #tpu.dot_dimension_numbers<[1], [0], [0], [1], [0, 0, 1, 1], [], []>} : vector<2x512xbf16>, vector<512x32xbf16>, vector<2x32xf32> -> vector<2x32xf32>
    %c0_74 = arith.constant 0 : index
    %c0_75 = arith.constant 0 : index
    %88 = vector.load %arg10[%c0_74, %c0_75] : memref<1x32xf32, #tpu.memory_space<vmem>>, vector<1x32xf32>
    %89 = vector.broadcast %88 : vector<1x32xf32> to vector<2x32xf32>
    %90 = arith.addf %87, %89 : vector<2x32xf32>
    %cst_76 = arith.constant 0.000000e+00 : f32
    %91 = vector.broadcast %cst_76 : f32 to vector<2x32xf32>
    %92 = arith.maximumf %90, %91 : vector<2x32xf32>
    %93 = arith.truncf %92 : vector<2x32xf32> to vector<2x32xbf16>
    %c0_77 = arith.constant 0 : index
    %c0_78 = arith.constant 0 : index
    %94 = vector.load %arg11[%c0_77, %c0_78] : memref<32x10xbf16, #tpu.memory_space<vmem>>, vector<32x10xbf16>
    %cst_79 = arith.constant dense<0.000000e+00> : vector<2x10xf32>
    %95 = tpu.matmul %93, %94, %cst_79 {dimension_numbers = #tpu.dot_dimension_numbers<[1], [0], [0], [1], [0, 0, 1, 1], [], []>} : vector<2x32xbf16>, vector<32x10xbf16>, vector<2x10xf32> -> vector<2x10xf32>
    %c0_80 = arith.constant 0 : index
    %c0_81 = arith.constant 0 : index
    %96 = vector.load %arg12[%c0_80, %c0_81] : memref<1x10xf32, #tpu.memory_space<vmem>>, vector<1x10xf32>
    %97 = vector.broadcast %96 : vector<1x10xf32> to vector<2x10xf32>
    %98 = arith.addf %95, %97 : vector<2x10xf32>
    %c0_82 = arith.constant 0 : index
    %c0_83 = arith.constant 0 : index
    %99 = vector.load %arg13[%c0_82, %c0_83] : memref<2x10xf32, #tpu.memory_space<vmem>>, vector<2x10xf32>
    tpu.vector_store %arg13[%c0_82, %c0_83], %98 {strides = array<i32>} : memref<2x10xf32, #tpu.memory_space<vmem>>, vector<2x10xf32>,
    return
  }
  func.func @transform_0(%arg0: i32) -> (i32, i32, i32) {
    %c0_i32 = arith.constant 0 : i32
    %c0_i32_0 = arith.constant 0 : i32
    %c0_i32_1 = arith.constant 0 : i32
    %c0_i32_2 = arith.constant 0 : i32
    return %c0_i32, %c0_i32_0, %c0_i32_1 : i32, i32, i32
  }
  func.func @transform_1(%arg0: i32) -> (i32, i32) {
    %c0_i32 = arith.constant 0 : i32
    %c0_i32_0 = arith.constant 0 : i32
    %c0_i32_1 = arith.constant 0 : i32
    return %c0_i32, %c0_i32_0 : i32, i32
  }
  func.func @transform_2(%arg0: i32) -> (i32, i32) {
    %c0_i32 = arith.constant 0 : i32
    %c0_i32_0 = arith.constant 0 : i32
    %c0_i32_1 = arith.constant 0 : i32
    return %c0_i32, %c0_i32_0 : i32, i32
  }
  func.func @transform_3(%arg0: i32) -> (i32, i32) {
    %c0_i32 = arith.constant 0 : i32
    %c0_i32_0 = arith.constant 0 : i32
    %c0_i32_1 = arith.constant 0 : i32
    return %c0_i32, %c0_i32_0 : i32, i32
  }
  func.func @transform_4(%arg0: i32) -> (i32, i32) {
    %c0_i32 = arith.constant 0 : i32
    %c0_i32_0 = arith.constant 0 : i32
    %c0_i32_1 = arith.constant 0 : i32
    return %c0_i32, %c0_i32_0 : i32, i32
  }
  func.func @transform_5(%arg0: i32) -> (i32, i32) {
    %c0_i32 = arith.constant 0 : i32
    %c0_i32_0 = arith.constant 0 : i32
    %c0_i32_1 = arith.constant 0 : i32
    return %c0_i32, %c0_i32_0 : i32, i32
  }
  func.func @transform_6(%arg0: i32) -> (i32, i32) {
    %c0_i32 = arith.constant 0 : i32
    %c0_i32_0 = arith.constant 0 : i32
    %c0_i32_1 = arith.constant 0 : i32
    return %c0_i32, %c0_i32_0 : i32, i32
  }
  func.func @transform_7(%arg0: i32) -> (i32, i32) {
    %c0_i32 = arith.constant 0 : i32
    %c0_i32_0 = arith.constant 0 : i32
    %c0_i32_1 = arith.constant 0 : i32
    return %c0_i32, %c0_i32_0 : i32, i32
  }
  func.func @transform_8(%arg0: i32) -> (i32, i32) {
    %c0_i32 = arith.constant 0 : i32
    %c0_i32_0 = arith.constant 0 : i32
    %c0_i32_1 = arith.constant 0 : i32
    return %c0_i32, %c0_i32_0 : i32, i32
  }
  func.func @transform_9(%arg0: i32) -> (i32, i32) {
    %c0_i32 = arith.constant 0 : i32
    %c0_i32_0 = arith.constant 0 : i32
    %c0_i32_1 = arith.constant 0 : i32
    return %c0_i32, %c0_i32_0 : i32, i32
  }
  func.func @transform_10(%arg0: i32) -> (i32, i32) {
    %c0_i32 = arith.constant 0 : i32
    %c0_i32_0 = arith.constant 0 : i32
    %c0_i32_1 = arith.constant 0 : i32
    return %c0_i32, %c0_i32_0 : i32, i32
  }
  func.func @transform_11(%arg0: i32) -> (i32, i32) {
    %c0_i32 = arith.constant 0 : i32
    %c0_i32_0 = arith.constant 0 : i32
    %c0_i32_1 = arith.constant 0 : i32
    return %c0_i32, %c0_i32_0 : i32, i32
  }
  func.func @transform_12(%arg0: i32) -> (i32, i32) {
    %c0_i32 = arith.constant 0 : i32
    %c0_i32_0 = arith.constant 0 : i32
    %c0_i32_1 = arith.constant 0 : i32
    return %c0_i32, %c0_i32_0 : i32, i32
  }
}

</mosaic_0001>

<bundles_post_ra>
// kernel: forward.1
= control target key start
LH: loop header
LB: loop body
LE: loop exit
PB: predicated region body
PF: predicated region fallthrough
CT: control target
= control target key end

     0   :  { %17 = vsyncpa [#allocation5], 0  ;;  %s2927_s0 = inlined_call_operand.hbm [shape: f32[2,64,16], index: 0, kind: input, shape index: {}]   ;;  %s2928_s1 = inlined_call_operand.hbm [shape: bf16[384,128], index: 1, kind: input, shape index: {}]   ;;  %s2929_s2 = inlined_call_operand.vmem [shape: f32[1,128], index: 2, kind: input, shape index: {}]   ;;  %s2930_s3 = inlined_call_operand.vmem [shape: f32[1,128], index: 3, kind: input, shape index: {}]   ;;  %s2931_s4 = inlined_call_operand.vmem [shape: f32[1,128], index: 4, kind: input, shape index: {}]   ;;  %s2932_s5 = inlined_call_operand.hbm [shape: f32[128,128], index: 5, kind: input, shape index: {}]   ;;  %s2933_s6 = inlined_call_operand.hbm [shape: bf16[384,128], index: 6, kind: input, shape index: {}]   ;;  %s2934_s7 = inlined_call_operand.vmem [shape: f32[1,128], index: 7, kind: input, shape index: {}]   ;;  %s2935_s8 = inlined_call_operand.hbm [shape: bf16[512,32], index: 8, kind: input, shape index: {}]   ;;  %s2936_s9 = inlined_call_operand.vmem [shape: f32[1,32], index: 9, kind: input, shape index: {}]   ;;  %s2937_s10 = inlined_call_operand.vmem [shape: bf16[32,10], index: 10, kind: input, shape index: {}]   ;;  %s2938_s11 = inlined_call_operand.vmem [shape: f32[1,10], index: 11, kind: input, shape index: {}]   ;;  %s2939_s12 = inlined_call_operand.hbm [shape: f32[2,10], index: 12, kind: output, shape index: {}]  }
   0x1   :  { %18 = vsyncpa [#allocation8], 0 }
   0x2   :  { %19 = vsyncpa [#allocation11], 0 }
   0x3   :  { %20 = vsyncpa [#allocation6], 0  ;;  %s2486_s21 = smov [#allocation7]  }
   0x4   :  { %s38_s22 = sshll.u32 %s2486_s21, 4  ;;  %s39_s22 = int_to_ptr.vmem [resolvable:$true] %s38_s22 }
   0x5   :  { %s2366_s23 = scalar_lea.vmem %s39_s22, 3072  ;;  %p2371_p1 = scmp.lt.s32.totalorder %s39_s22, %s39_s22 }
   0x6   :  { %p2367_p0 = scmp.ne.s32.totalorder %s39_s22, %s2366_s23  ;;  %p2372_p2 = scmp.lt.s32.totalorder %s2366_s23, %s2366_s23 }
   0x8   :  { %p2373_p3 = por %p2372_p2, %p2371_p1 }
   0xa   :  { %p2374_p4 = pnand %p2373_p3, %p2367_p0 }
   0xc   :  { %2377 = shalt.err (!%p2374_p4)
}
   0xd   :  { %s2487_s24 = smov 64   ;;  %s2488_s25 = smov 4  }
   0xe   :  { %44 = dma.hbm_to_vmem [thread:$0]  %s2928_s1, 3072, %s39_s22, [#allocation8], %s2487_s24, %s2487_s24, %s2488_s25  }
   0xf   :  { %s2489_s28 = smov [#allocation10]   ;;  %s2490_s30 = smov [#allocation4]  }
  0x10   :  { %s68_s29 = sshll.u32 %s2489_s28, 4  ;;  %s26_s13 = sshll.u32 %s2490_s30, 4  ;;  %s69_s29 = int_to_ptr.vmem [resolvable:$true] %s68_s29  ;;  %s27_s13 = int_to_ptr.vmem [resolvable:$true] %s26_s13 }
  0x11   :  { %s2386_s14 = scalar_lea.vmem %s69_s29, 3072  ;;  %p2391_p6 = scmp.lt.s32.totalorder %s69_s29, %s69_s29 }
  0x12   :  { %p2387_p5 = scmp.ne.s32.totalorder %s69_s29, %s2386_s14  ;;  %p2392_p7 = scmp.lt.s32.totalorder %s2386_s14, %s2386_s14 }
  0x14   :  { %p2393_p8 = por %p2392_p7, %p2391_p6 }
  0x16   :  { %p2394_p9 = pnand %p2393_p8, %p2387_p5 }
  0x18   :  { %2397 = shalt.err (!%p2394_p9)
}
  0x19   :  { %74 = dma.hbm_to_vmem [thread:$0]  %s2933_s6, 3072, %s69_s29, [#allocation11], %s2487_s24, %s2487_s24, %s2488_s25  }
  0x1a   :  { %s2406_s1 = scalar_lea.vmem %s27_s13, 2048  ;;  %p2411_p11 = scmp.lt.s32.totalorder %s27_s13, %s27_s13 }
  0x1b   :  { %p2407_p10 = scmp.ne.s32.totalorder %s27_s13, %s2406_s1  ;;  %p2412_p12 = scmp.lt.s32.totalorder %s2406_s1, %s2406_s1 }
  0x1d   :  { %p2413_p13 = por %p2412_p12, %p2411_p11 }
  0x1f   :  { %p2414_p0 = pnand %p2413_p13, %p2407_p10 }
  0x21   :  { %2417 = shalt.err (!%p2414_p0)
}
  0x22   :  { %s2491_s17 = smov 128   ;;  %s2492_s18 = smov 8  }
  0x23   :  { %32 = dma.hbm_to_vmem [thread:$0]  %s2927_s0, 2048, %s27_s13, [#allocation5], %s2491_s17, %s2491_s17, %s2492_s18  }
  0x24   :  { %s2493_s21 = smov [#allocation9]   ;;  %s2494_s23 = smov [#allocation12]  }
  0x25   :  { %s56_s22 = sshll.u32 %s2493_s21, 4  ;;  %s82_s26 = sshll.u32 %s2494_s23, 4  ;;  %s57_s22 = int_to_ptr.vmem [resolvable:$true] %s56_s22  ;;  %s83_s26 = int_to_ptr.vmem [resolvable:$true] %s82_s26 }
  0x26   :  { %s2426_s6 = scalar_lea.vmem %s57_s22, 2048  ;;  %p2431_p2 = scmp.lt.s32.totalorder %s57_s22, %s57_s22 }
  0x27   :  { %p2427_p1 = scmp.ne.s32.totalorder %s57_s22, %s2426_s6  ;;  %p2432_p3 = scmp.lt.s32.totalorder %s2426_s6, %s2426_s6 }
  0x29   :  { %p2433_p4 = por %p2432_p3, %p2431_p2 }
  0x2b   :  { %p2434_p5 = pnand %p2433_p4, %p2427_p1 }
  0x2d   :  { %2437 = shalt.err (!%p2434_p5)
}
  0x2e   :  { %62 = dma.hbm_to_vmem [thread:$0]  %s2932_s5, 2048, %s57_s22, [#allocation8], %s2491_s17, %s2491_s17, %s2492_s18  }
  0x2f   :  { %s2446_s29 = scalar_lea.vmem %s83_s26, 4096  ;;  %p2451_p7 = scmp.lt.s32.totalorder %s83_s26, %s83_s26 }
  0x30   :  { %p2447_p6 = scmp.ne.s32.totalorder %s83_s26, %s2446_s29  ;;  %p2452_p8 = scmp.lt.s32.totalorder %s2446_s29, %s2446_s29 }
  0x32   :  { %p2453_p9 = por %p2452_p8, %p2451_p7 }
  0x34   :  { %p2454_p10 = pnand %p2453_p9, %p2447_p6 }
  0x36   :  { %2457 = shalt.err (!%p2454_p10)
}
  0x37   :  { %88 = dma.hbm_to_vmem [thread:$0]  %s2935_s8, 4096, %s83_s26, [#allocation11], %s2487_s24, %s2487_s24, %s2488_s25  }
  0x38   :  { %2478 = dma.done.wait [#allocation5], 2048  }
  0x39   :  { %2479 = vsyncadd [#allocation5], 4294965248 }
  0x3a   :  { %2480 = dma.done.wait [#allocation8], 5120  }
  0x3b   :  { %2481 = vsyncadd [#allocation8], 4294962176 }
  0x3c   :  { %2482 = dma.done.wait [#allocation11], 7168  }
  0x3d   :  { %2483 = vsyncadd [#allocation11], 4294960128  ;;  %vm115_vm0 = vcmask 1048064   ;;  %v2495_v0 = vmov 0.0   ;;  %vm118_vm1 = vcmask 1041920   ;;  %v127_v1 = vld [vmem:[#allocation4 + $0x20] sm:$0xff] }
  0x3e   :  { %111 = vst [vmem:[#allocation2] sm:$0x1] %v2495_v0  ;;  %117 = vst.msk [vmem:[#allocation2 + $0x8] sm:$0xff] %vm115_vm0, %v2495_v0  ;;  %v125_v2 = vld [vmem:[#allocation4 + $0x10] sm:$0xff]  ;;  %s2496_s5 = smov 32   ;;  %s2497_s8 = smov 16  }
  0x3f   :  { %112 = vst [vmem:[#allocation2 + $0x18] sm:$0x1] %v2495_v0  ;;  %113 = vst [vmem:[#allocation2 + $0x11] sm:$0x1] %v2495_v0  ;;  %169 = vrot.lane.b32.xlu1 %v127_v1, %s2496_s5  ;;  %148 = vrot.lane.b32.xlu0 %v125_v2, %s2497_s8  ;;  %v128_v3 = vld [vmem:[#allocation4 + $0x28] sm:$0xff]  ;;  %v126_v4 = vld [vmem:[#allocation4 + $0x18] sm:$0xff] }
  0x40   :  { %114 = vst [vmem:[#allocation2 + $0x29] sm:$0x1] %v2495_v0  ;;  %121 = vst.msk [vmem:[#allocation2 + $0x20] sm:$0xff] %vm115_vm0, %v2495_v0  ;;  %v130_v5 = vld [vmem:[#allocation4 + $0x38] sm:$0xff]  ;;  %v129_v6 = vld [vmem:[#allocation4 + $0x30] sm:$0xff]  ;;  %s2498_s24 = smov 48  }
  0x41   :  { %978 = vst [vmem:[#allocation3] sm:$0x1] %v2495_v0  ;;  %979 = vst [vmem:[#allocation3 + $0x10] sm:$0x1] %v2495_v0  ;;  %v2274_v7 = vld [vmem:[#allocation7 + $0x78] sm:$0xff]   ;;  %v2276_v9 = vld [vmem:[#allocation7 + $0x70] sm:$0xff]  }
  0x42   :  { %980 = vst [vmem:[#allocation3 + $0x9] sm:$0x1] %v2495_v0  ;;  %981 = vst [vmem:[#allocation3 + $0x19] sm:$0x1] %v2495_v0  ;;  %v2275_v8 = vld [vmem:[#allocation7 + $0x38] sm:$0xff]   ;;  %2038 = vmatprep.subr.bf16.mxu0 %v2274_v7  ;;  %v2277_v10 = vld [vmem:[#allocation7 + $0x30] sm:$0xff]  }
  0x43   :  { %116 = vst.msk [vmem:[#allocation2] sm:$0xff] %vm115_vm0, %v2495_v0  ;;  %120 = vst.msk [vmem:[#allocation2 + $0x18] sm:$0xff] %vm115_vm0, %v2495_v0  ;;  %171 = vrot.lane.b32.xlu1 %v128_v3, %s2496_s5  ;;  %150 = vrot.lane.b32.xlu0 %v126_v4, %s2497_s8  ;;  %v134_v11 = vld [vmem:[#allocation4 + $0x58] sm:$0xff]  ;;  %v133_v12 = vld [vmem:[#allocation4 + $0x50] sm:$0xff]  ;;  %vm139_vm2 = vcmask 130048   ;;  %vm160_vm3 = vcmask 261248  }
  0x44   :  { %119 = vst.msk [vmem:[#allocation2 + $0x10] sm:$0x3] %vm118_vm1, %v2495_v0  ;;  %122 = vst.msk [vmem:[#allocation2 + $0x28] sm:$0x3] %vm118_vm1, %v2495_v0  ;;  %2039 = vmatpush3.bf16.msra.mxu0 %v2275_v8  ;;  %v2278_v13 = vld [vmem:[#allocation7 + $0x68] sm:$0xff]   ;;  %v2280_v15 = vld [vmem:[#allocation7 + $0xb8] sm:$0xff]  }
  0x45   :  { %2040 = vmatprep.subr.bf16.mxu0 %v2276_v9  ;;  %v2279_v14 = vld [vmem:[#allocation7 + $0x28] sm:$0xff]   ;;  %v2281_v16 = vld [vmem:[#allocation7 + $0x60] sm:$0xff]   ;;  %2171 = vmatprep.subr.bf16.mxu1 %v2280_v15  ;;  %v2283_v20 = vld [vmem:[#allocation7 + $0xb0] sm:$0xff]   ;;  %vm181_vm4 = vcmask 392448   ;;  %vm202_vm5 = vcmask 523648   ;;  %vm2499_vm6 = vmmov 0  }
  0x46   :  { %v136_v17 = vld [vmem:[#allocation4 + $0x68] sm:$0xff]  ;;  %v123_v18 = vld [vmem:[#allocation4] sm:$0xff]  ;;  %2172 = vmatpush3.bf16.msra.mxu1 %v2280_v15  ;;  %v138_v23 = vld [vmem:[#allocation4 + $0x78] sm:$0xff]  ;;  %vm544_vm7 = vcmask 1040384   ;;  %vm774_vm8 = vcmask 1041408   ;;  %vm903_vm9 = vcmask 1041409  }
  0x47   :  { %192 = vrot.lane.b32.xlu1 %v130_v5, %s2498_s24  ;;  %190 = vrot.lane.b32.xlu0 %v129_v6, %s2498_s24  ;;  %v135_v19 = vld [vmem:[#allocation4 + $0x60] sm:$0xff]  ;;  %140 = vst.msk [vmem:[#allocation2 + $0x1] sm:$0xff] %vm139_vm2, %v123_v18  ;;  %v124_v22 = vld [vmem:[#allocation4 + $0x8] sm:$0xff]  ;;  %v137_v24 = vld [vmem:[#allocation4 + $0x70] sm:$0xff]  ;;  %vm905_vm10 = vcmask 1042434   ;;  %vm907_vm11 = vcmask 1043459  }
  0x48   :  { %2041 = vmatpush3.bf16.msra.mxu0 %v2277_v10  ;;  %v2282_v21 = vld [vmem:[#allocation7 + $0x20] sm:$0xff]   ;;  %2173 = vmatprep.subr.bf16.mxu1 %v2283_v20  ;;  %v2284_v25 = vld [vmem:[#allocation7 + $0x58] sm:$0xff]   ;;  %141 = vst.msk [vmem:[#allocation2 + $0x9] sm:$0xff] %vm139_vm2, %v124_v22  ;;  %v2286_v26 = vld [vmem:[#allocation7 + $0xa8] sm:$0xff]   ;;  %vm909_vm12 = vcmask 1044484   ;;  %vm911_vm13 = vcmask 1045509  }
  0x49   :  { %2042 = vmatprep.subr.bf16.mxu0 %v2278_v13  ;;  %v2285_v27 = vld [vmem:[#allocation7 + $0x18] sm:$0xff]   ;;  %v2287_v28 = vld [vmem:[#allocation7 + $0x50] sm:$0xff]   ;;  %v2289_v29 = vld [vmem:[#allocation7 + $0xa0] sm:$0xff]   ;;  %vm913_vm14 = vcmask 1046534   ;;  %vm915_vm15 = vcmask 1047559   ;;  %vm1888_vm0 = vcmask 261120  }
  0x4a   :  { %2174 = vmatpush3.bf16.msra.mxu1 %v2283_v20  ;;  %v2288_v30 = vld [vmem:[#allocation7 + $0x10] sm:$0xff]   ;;  %v132_v31 = vld [vmem:[#allocation4 + $0x48] sm:$0xff]  ;;  %v131_v32 = vld [vmem:[#allocation4 + $0x40] sm:$0xff]  ;;  %vm1932_vm1 = vcmask 74752  }
  0x4b   :  { %154 = vrot.lane.b32.xlu1 %v134_v11, %s2497_s8  ;;  %152 = vrot.lane.b32.xlu0 %v133_v12, %s2497_s8  ;;  %143 = vst.msk [vmem:[#allocation2 + $0x21] sm:$0xff] %vm139_vm2, %v132_v31  ;;  %v2290_v33 = vld [vmem:[#allocation7 + $0x48] sm:$0xff]   ;;  %142 = vst.msk [vmem:[#allocation2 + $0x19] sm:$0xff] %vm139_vm2, %v131_v32  ;;  %v2292_v34 = vld [vmem:[#allocation7 + $0x98] sm:$0xff]  }
  0x4c   :  { %2043 = vmatpush3.bf16.msra.mxu0 %v2279_v14  ;;  %2175 = vmatprep.subr.bf16.mxu1 %v2286_v26  ;;  %v2291_v35 = vld [vmem:[#allocation7 + $0x8] sm:$0xff]   ;;  %v2295_v36 = vld [vmem:[#allocation7 + $0x90] sm:$0xff]   ;;  %v2293_v37 = vld [vmem:[#allocation7 + $0x40] sm:$0xff]  }
  0x4d   :  { %2044 = vmatprep.subr.bf16.mxu0 %v2281_v16  ;;  %v2294_v38 = vld [vmem:[#allocation7] sm:$0xff]   ;;  %v2296_v39 = vld [vmem:[#allocation7 + $0x88] sm:$0xff]   ;;  %v561_v8 = vld [vmem:[#allocation9 + $0x78] sm:$0xff] }
  0x4e   :  { %2176 = vmatpush3.bf16.msra.mxu1 %v2286_v26  ;;  %v2297_v40 = vld [vmem:[#allocation7 + $0x80] sm:$0xff]   ;;  %v560_v9 = vld [vmem:[#allocation9 + $0x70] sm:$0xff]  ;;  %v559_v10 = vld [vmem:[#allocation9 + $0x68] sm:$0xff] }
  0x4f   :  { %175 = vrot.lane.b32.xlu1 %v136_v17, %s2496_s5  ;;  %173 = vrot.lane.b32.xlu0 %v135_v19, %s2496_s5  ;;  %v558_v11 = vld [vmem:[#allocation9 + $0x60] sm:$0xff]  ;;  %v557_v12 = vld [vmem:[#allocation9 + $0x58] sm:$0xff]  ;;  %v556_v13 = vld [vmem:[#allocation9 + $0x50] sm:$0xff] }
  0x50   :  { %2045 = vmatpush3.bf16.msra.mxu0 %v2282_v21  ;;  %2177 = vmatprep.subr.bf16.mxu1 %v2289_v29  ;;  %v555_v14 = vld [vmem:[#allocation9 + $0x48] sm:$0xff]  ;;  %v554_v15 = vld [vmem:[#allocation9 + $0x40] sm:$0xff]  ;;  %v553_v16 = vld [vmem:[#allocation9 + $0x38] sm:$0xff] }
  0x51   :  { %2046 = vmatprep.subr.bf16.mxu0 %v2284_v25  ;;  %v552_v17 = vld [vmem:[#allocation9 + $0x30] sm:$0xff]  ;;  %v551_v18 = vld [vmem:[#allocation9 + $0x28] sm:$0xff]  ;;  %v550_v19 = vld [vmem:[#allocation9 + $0x20] sm:$0xff] }
  0x52   :  { %2178 = vmatpush3.bf16.msra.mxu1 %v2289_v29  ;;  %v549_v20 = vld [vmem:[#allocation9 + $0x18] sm:$0xff]  ;;  %v548_v21 = vld [vmem:[#allocation9 + $0x10] sm:$0xff]  ;;  %v547_v22 = vld [vmem:[#allocation9 + $0x8] sm:$0xff] }
  0x53   :  { %196 = vrot.lane.b32.xlu1 %v138_v23, %s2498_s24  ;;  %194 = vrot.lane.b32.xlu0 %v137_v24, %s2498_s24  ;;  %v546_v23 = vld [vmem:[#allocation9] sm:$0xff]  ;;  %v1951_v29 = vld [vmem:[%s2929_s2] ss:$0 sm:$0xff] }
  0x54   :  { %2047 = vmatpush3.bf16.msra.mxu0 %v2285_v27  ;;  %2179 = vmatprep.subr.bf16.mxu1 %v2292_v34 }
  0x55   :  { %2048 = vmatprep.subr.bf16.mxu0 %v2287_v28 }
  0x56   :  { %2180 = vmatpush3.bf16.msra.mxu1 %v2292_v34 }
  0x57   :  { %2181 = vmatprep.subr.bf16.mxu1 %v2295_v36 }
  0x58   :  { %2049 = vmatpush3.bf16.msra.mxu0 %v2288_v30 }
  0x59   :  { %2050 = vmatprep.subr.bf16.mxu0 %v2290_v33 }
  0x5a   :  { %2182 = vmatpush3.bf16.msra.mxu1 %v2295_v36 }
  0x5b   :  { %2183 = vmatprep.subr.bf16.mxu1 %v2296_v39 }
  0x5c   :  { %2051 = vmatpush3.bf16.msra.mxu0 %v2291_v35 }
  0x5d   :  { %2052 = vmatprep.subr.bf16.mxu0 %v2293_v37 }
  0x5e   :  { %2184 = vmatpush3.bf16.msra.mxu1 %v2296_v39 }
  0x5f   :  { %2185 = vmatprep.subr.bf16.mxu1 %v2297_v40 }
  0x60   :  { %2053 = vmatpush3.bf16.msra.mxu0 %v2294_v38 }
  0x61   :  { %2191 = vmatprep.subr.mxu0 %v2495_v0 }
  0x62   :  { %2186 = vmatpush3.bf16.msra.mxu1 %v2297_v40 }
  0xb1   :  { %v170_v41 = vpop.permute.xlu1 %169  ;;  %v149_v42 = vpop.permute.xlu0 %148 }
  0xb2   :  { %161 = vst.msk [vmem:[#allocation2 + $0x1] sm:$0xff] %vm160_vm3, %v149_v42 }
  0xb3   :  { %182 = vst.msk [vmem:[#allocation2 + $0x1] sm:$0xff] %vm181_vm4, %v170_v41 }
  0xb5   :  { %v172_v43 = vpop.permute.xlu1 %171  ;;  %v151_v44 = vpop.permute.xlu0 %150 }
  0xb6   :  { %162 = vst.msk [vmem:[#allocation2 + $0x9] sm:$0xff] %vm160_vm3, %v151_v44 }
  0xb7   :  { %183 = vst.msk [vmem:[#allocation2 + $0x9] sm:$0xff] %vm181_vm4, %v172_v43 }
  0xb9   :  { %v193_v45 = vpop.permute.xlu1 %192  ;;  %v191_v46 = vpop.permute.xlu0 %190 }
  0xba   :  { %204 = vst.msk [vmem:[#allocation2 + $0x9] sm:$0xff] %vm202_vm5, %v193_v45  ;;  %203 = vst.msk [vmem:[#allocation2 + $0x1] sm:$0xff] %vm202_vm5, %v191_v46 }
  0xbd   :  { %v155_v47 = vpop.permute.xlu1 %154  ;;  %v153_v48 = vpop.permute.xlu0 %152 }
  0xbe   :  { %164 = vst.msk [vmem:[#allocation2 + $0x21] sm:$0xff] %vm160_vm3, %v155_v47  ;;  %163 = vst.msk [vmem:[#allocation2 + $0x19] sm:$0xff] %vm160_vm3, %v153_v48 }
  0xc1   :  { %v176_v49 = vpop.permute.xlu1 %175  ;;  %v174_v50 = vpop.permute.xlu0 %173  ;;  %v211_v51 = vld [vmem:[#allocation2 + $0x1] sm:$0xff]  ;;  %v212_v52 = vld [vmem:[#allocation2 + $0x9] sm:$0xff] }
  0xc2   :  { %v215_v53 = vld [vmem:[#allocation2 + $0x2] sm:$0xff]  ;;  %185 = vst.msk [vmem:[#allocation2 + $0x21] sm:$0xff] %vm181_vm4, %v176_v49  ;;  %184 = vst.msk [vmem:[#allocation2 + $0x19] sm:$0xff] %vm181_vm4, %v174_v50  ;;  %v220_v54 = vpack.c.bf16 %v212_v52, %v211_v51  ;;  %v216_v55 = vld [vmem:[#allocation2 + $0xa] sm:$0xff] }
  0xc3   :  { %v207_v56 = vld [vmem:[#allocation2] sm:$0xff]  ;;  %v208_v57 = vld [vmem:[#allocation2 + $0x8] sm:$0xff]  ;;  %v221_v58 = vpack.c.bf16 %v216_v55, %v215_v53 }
  0xc4   :  { %v219_v59 = vpack.c.bf16 %v208_v57, %v207_v56  ;;  %456 = vmatprep.mubr.bf16.mxu0 %v220_v54 }
  0xc5   :  { %2187 = vmatprep.mubr.bf16.mxu1 %v221_v58  ;;  %v197_v60 = vpop.permute.xlu1 %196  ;;  %v195_v61 = vpop.permute.xlu0 %194 }
  0xc6   :  { %457 = vmatmul.mubr.bf16.vlgmr.msra.gmra.mxu0 %v219_v59  ;;  %206 = vst.msk [vmem:[#allocation2 + $0x21] sm:$0xff] %vm202_vm5, %v197_v60  ;;  %205 = vst.msk [vmem:[#allocation2 + $0x19] sm:$0xff] %vm202_vm5, %v195_v61 }
  0xc7   :  { %2192 = vmatpush3.msra.mxu0 %v561_v8 }
  0xc8   :  { %2193 = vmatprep.subr.mxu0 %v2495_v0 }
  0xc9   :  { %2194 = vmatpush3.msra.mxu0 %v560_v9  ;;  %v2298_v9 = vld [vmem:[#allocation10 + $0x78] sm:$0xff]  }
  0xca   :  { %2195 = vmatprep.subr.mxu0 %v2495_v0  ;;  %2093 = vmatprep.subr.bf16.mxu1 %v2298_v9 }
  0xcb   :  { %2196 = vmatpush3.msra.mxu0 %v559_v10  ;;  %v2299_v10 = vld [vmem:[#allocation10 + $0xb8] sm:$0xff]  }
  0xcc   :  { %2197 = vmatprep.subr.mxu0 %v2495_v0 }
  0xcd   :  { %v213_v62 = vld [vmem:[#allocation2 + $0x19] sm:$0xff]  ;;  %v214_v63 = vld [vmem:[#allocation2 + $0x21] sm:$0xff]  ;;  %2198 = vmatpush3.msra.mxu0 %v558_v11 }
  0xce   :  { %v217_v1 = vld [vmem:[#allocation2 + $0x1a] sm:$0xff]  ;;  %v223_v2 = vpack.c.bf16 %v214_v63, %v213_v62  ;;  %v218_v3 = vld [vmem:[#allocation2 + $0x22] sm:$0xff]  ;;  %2199 = vmatprep.subr.mxu0 %v2495_v0 }
  0xcf   :  { %v209_v4 = vld [vmem:[#allocation2 + $0x18] sm:$0xff]  ;;  %v210_v5 = vld [vmem:[#allocation2 + $0x20] sm:$0xff]  ;;  %v224_v6 = vpack.c.bf16 %v218_v3, %v217_v1  ;;  %2200 = vmatpush3.msra.mxu0 %v557_v12  ;;  %v2300_v11 = vld [vmem:[#allocation10 + $0x38] sm:$0xff]  }
  0xd0   :  { %v222_v7 = vpack.c.bf16 %v210_v5, %v209_v4  ;;  %464 = vmatprep.mubr.bf16.mxu0 %v223_v2  ;;  %2201 = vmatprep.subr.mxu0 %v2495_v0  ;;  %v2301_v12 = vld [vmem:[#allocation10 + $0x70] sm:$0xff]  }
  0xd1   :  { %2188 = vmatmul.mubr.bf16.vlgmr.msra.gmra.mxu1 %v224_v6  ;;  %2202 = vmatpush3.msra.mxu0 %v556_v13  ;;  %v2302_v13 = vld [vmem:[#allocation10 + $0xb0] sm:$0xff]  }
  0xd2   :  { %465 = vmatmul.mubr.bf16.gmra.mxu0 %v222_v7  ;;  %2203 = vmatprep.subr.mxu0 %v2495_v0 }
  0xd3   :  { %2204 = vmatpush3.msra.mxu0 %v555_v14  ;;  %2223 = vmatprep.mubr.msk.f32.mxu0 %vm2499_vm6, %v2495_v0  ;;  %v2303_v14 = vld [vmem:[#allocation10 + $0x30] sm:$0xff]  }
  0xd4   :  { %2205 = vmatprep.subr.mxu0 %v2495_v0  ;;  %2094 = vmatpush3.bf16.msra.mxu1 %v2300_v11 }
  0xd5   :  { %2206 = vmatpush3.msra.mxu0 %v554_v15  ;;  %2095 = vmatprep.subr.bf16.mxu1 %v2301_v12 }
  0xd6   :  { %2207 = vmatprep.subr.mxu0 %v2495_v0 }
  0xd7   :  { %2208 = vmatpush3.msra.mxu0 %v553_v16 }
  0xd8   :  { %2209 = vmatprep.subr.mxu0 %v2495_v0  ;;  %2096 = vmatpush3.bf16.msra.mxu1 %v2303_v14 }
  0xd9   :  { %2210 = vmatpush3.msra.mxu0 %v552_v17 }
  0xda   :  { %2211 = vmatprep.subr.mxu0 %v2495_v0 }
  0xdb   :  { %2212 = vmatpush3.msra.mxu0 %v551_v18 }
  0xdc   :  { %2213 = vmatprep.subr.mxu0 %v2495_v0 }
  0xdd   :  { %2214 = vmatpush3.msra.mxu0 %v550_v19 }
  0xde   :  { %2215 = vmatprep.subr.mxu0 %v2495_v0 }
  0xdf   :  { %2216 = vmatpush3.msra.mxu0 %v549_v20 }
  0xe0   :  { %2217 = vmatprep.subr.mxu0 %v2495_v0 }
  0xe1   :  { %2218 = vmatpush3.msra.mxu0 %v548_v21 }
  0xe2   :  { %2219 = vmatprep.subr.mxu0 %v2495_v0 }
  0xe3   :  { %2220 = vmatpush3.msra.mxu0 %v547_v22  ;;  %v2500_v22 = vmov 1966171168  }
  0xe4   :  { %2221 = vmatprep.subr.mxu0 %v2495_v0 }
  0xe5   :  { %2222 = vmatpush3.msra.mxu0 %v546_v23  ;;  %v643_v23 = vunpack.c.l.s4 %v2500_v22 }
  0xe6   :  { %2226 = vmatprep.subr.bf16.mxu0 %v2495_v0 }
 0x186   :  { %v2054_v24 = vpop.f32.mrf.mxu0 }
 0x188   :  { %v2055_v25 = vpop.f32.mrf.mxu0 }
 0x189   :  { %v2056_v27 = vadd.f32 %v2055_v25, %v2054_v24  ;;  %v645_v24 = vlaneseq  ;;  %v644_v25 = vunpack.c.0.s8 %v643_v23 }
 0x18a   :  { %v2057_v26 = vpop.f32.mrf.mxu0 }
 0x18b   :  { %v459_v33 = vadd.f32 %v2056_v27, %v1951_v29 }
 0x18c   :  { %v2058_v28 = vpop.f32.mrf.mxu0 }
 0x18d   :  { %v2059_v32 = vadd.f32 %v2058_v28, %v2057_v26  ;;  %v2683_v26 = vshrl.u32 %v645_v24, 7 }
 0x18f   :  { %v462_v41 = vadd.f32 %v2059_v32, %v1951_v29  ;;  %v647_v27 = vsub.s32 %v644_v25, %v2683_v26 }
 0x191   :  { %v2189_v30 = vpop.f32.mrf.mxu1 }
 0x192   :  { %v2060_v31 = vpop.f32.mrf.mxu0 }
 0x193   :  { %v507_v34 = vpop.f32.mrf.mxu1 }
 0x194   :  { %v2061_v35 = vpop.f32.mrf.mxu0  ;;  %v2659_v37 = vadd.f32 %v507_v34, %v459_v33  ;;  %v662_v33 = vsub.s32 0, %v2683_v26 }
 0x195   :  { %v2062_v36 = vadd.f32 %v2061_v35, %v2060_v31  ;;  %v2190_v38 = vpop.f32.mrf.mxu1  ;;  %v638_v31 = vld [vmem:[%s2930_s3] sm:$0x1]  ;;  %v2501_v35 = vmov 1983009808   ;;  %s2502_s3 = smov 120  }
 0x196   :  { %v2063_v39 = vpop.f32.mrf.mxu0  ;;  %v531_v47 = vmul.f32 %v2659_v37, %v2659_v37 }
 0x197   :  { %v467_v40 = vadd.f32 %v2062_v36, %v1951_v29  ;;  %v510_v42 = vpop.f32.mrf.mxu1  ;;  %v692_v36 = vunpack.c.l.s4 %v2501_v35 }
 0x198   :  { %v2064_v43 = vpop.f32.mrf.mxu0  ;;  %v2663_v45 = vadd.f32 %v510_v42, %v462_v41 }
 0x199   :  { %v2661_v44 = vadd.f32 %v2189_v30, %v467_v40  ;;  %v2065_v46 = vadd.f32 %v2064_v43, %v2063_v39  ;;  %v669_v39 = vld [vmem:[%s2931_s4] sm:$0x1]  ;;  %v693_v41 = vunpack.c.0.s8 %v692_v36 }
 0x19a   :  { %v522_v49 = vadd.f32 %v2663_v45, %v2659_v37  ;;  %v532_v50 = vmul.f32 %v2663_v45, %v2663_v45 }
 0x19b   :  { %v533_v48 = vmul.f32 %v2661_v44, %v2661_v44  ;;  %v470_v51 = vadd.f32 %v2065_v46, %v1951_v29 }
 0x19c   :  { %v523_v52 = vadd.f32 %v522_v49, %v2661_v44  ;;  %v535_v53 = vadd.f32 %v532_v50, %v531_v47  ;;  %v2698_v50 = vsub.s32 %v693_v41, %v2683_v26 }
 0x19d   :  { %v2674_v54 = vadd.f32 %v2190_v38, %v470_v51 }
 0x19e   :  { %v536_v55 = vadd.f32 %v535_v53, %v533_v48 }
 0x19f   :  { %v524_v56 = vadd.f32 %v523_v52, %v2674_v54  ;;  %v534_v57 = vmul.f32 %v2674_v54, %v2674_v54 }
 0x1a1   :  { %v525_v58 = vrot.slane %v524_v56, 4  ;;  %v537_v59 = vadd.f32 %v536_v55, %v534_v57 }
 0x1a3   :  { %v526_v60 = vadd.f32 %v525_v58, %v524_v56  ;;  %v538_v61 = vrot.slane %v537_v59, 4 }
 0x1a5   :  { %v527_v62 = vrot.slane %v526_v60, 2  ;;  %v539_v63 = vadd.f32 %v538_v61, %v537_v59 }
 0x1a7   :  { %v528_v1 = vadd.f32 %v527_v62, %v526_v60  ;;  %v540_v2 = vrot.slane %v539_v63, 2 }
 0x1a9   :  { %v529_v3 = vrot.slane %v528_v1, 1  ;;  %v541_v4 = vadd.f32 %v540_v2, %v539_v63 }
 0x1ab   :  { %v542_v5 = vrot.slane %v541_v4, 1  ;;  %v530_v6 = vadd.f32 %v529_v3, %v528_v1 }
 0x1ad   :  { %v543_v7 = vadd.f32 %v542_v5, %v541_v4 }
 0x1af   :  { %v545_v8 = vsel %vm544_vm7, %v530_v6, %v543_v7 }
 0x1b0   :  { %2224 = vmatmul.mubr.f32.vlgmr.msra.gmra.mxu0 %v545_v8 }
 0x1b1   :  { %2242 = vmatprep.mubr.msk.bf16.mxu0 %vm2499_vm6, %v2495_v0  ;;  %2227 = vmatpush3.bf16.msra.mxu0 %v2299_v10 }
 0x1b2   :  { %2228 = vmatprep.subr.bf16.mxu0 %v2495_v0 }
 0x1b5   :  { %2229 = vmatpush3.bf16.msra.mxu0 %v2302_v13 }
 0x1b6   :  { %2230 = vmatprep.subr.bf16.mxu0 %v2495_v0 }
 0x270   :  { %v628_v15 = vpop.f32.mrf.mxu0 }
 0x271   :  { %v632_v16 = vmul.f32 %v628_v15, %v628_v15 }
 0x272   :  { %v2225_v17 = vpop.f32.mrf.mxu0 }
 0x273   :  { %v634_v18 = vrot.slane %v632_v16, 7 }
 0x275   :  { %v636_v19 = vsub.f32 %v628_v15, %v634_v18 }
 0x277   :  { %v637_v20 = vmax.f32 %v636_v19, 0.0 }
 0x279   :  { %v639_v21 = vadd.f32 1e-05, %v637_v20 }
 0x27b   :  { %2356 = vrsqrt.f32 %v639_v21 }
 0x288   :  { %v2357_v28 = vpop.eup %2356 }
 0x289   :  { %v648_v29 = vrot.slane %v2357_v28, %v647_v27 }
 0x28b   :  { %v649_v30 = vcombine.high %v648_v29, %v648_v29 }
 0x28d   :  { %v656_v32 = vrot.slane %v649_v30, %v647_v27 }
 0x28f   :  { %v658_v34 = vmul.f32 %v656_v32, %v638_v31 }
 0x291   :  { %v663_v38 = vrot.slane %v658_v34, %v662_v33  ;;  %v670_v40 = vmul.f32 %v658_v34, %v628_v15 }
 0x293   :  { %v671_v42 = vsub.f32 %v669_v39, %v670_v40  ;;  %v665_v43 = vmul.f32 %v663_v38, %v2659_v37  ;;  %v666_v46 = vmul.f32 %v663_v38, %v2663_v45  ;;  %v667_v47 = vmul.f32 %v663_v38, %v2661_v44 }
 0x294   :  { %v668_v48 = vmul.f32 %v663_v38, %v2674_v54 }
 0x295   :  { %v676_v49 = vrot.slane %v671_v42, %v662_v33 }
 0x297   :  { %v678_v51 = vadd.f32 %v676_v49, %v665_v43  ;;  %v679_v52 = vadd.f32 %v676_v49, %v666_v46  ;;  %v680_v53 = vadd.f32 %v676_v49, %v667_v47  ;;  %v681_v55 = vadd.f32 %v676_v49, %v668_v48 }
 0x299   :  { %v682_v56 = vmax.f32 %v678_v51, 0.0  ;;  %v2700_v57 = vmax.f32 %v679_v52, 0.0  ;;  %v684_v58 = vmax.f32 %v680_v53, 0.0  ;;  %v685_v59 = vmax.f32 %v681_v55, 0.0 }
 0x29b   :  { %v690_v37 = vcombine.high %v682_v56, %v682_v56  ;;  %v697_v45 = vrot.slane %v682_v56, %v2698_v50  ;;  %v2705_v44 = vrot.slane %v2700_v57, %v2698_v50  ;;  %v724_v54 = vcombine.high %v684_v58, %v684_v58 }
 0x29c   :  { %v731_v60 = vrot.slane %v684_v58, %v2698_v50  ;;  %v748_v61 = vrot.slane %v685_v59, %v2698_v50  ;;  %v741_v62 = vcombine.high %v685_v59, %v685_v59  ;;  %v707_v63 = vcombine.high %v2700_v57, %v2700_v57 }
 0x29d   :  { %v2712_v1 = vrot.slane %v690_v37, %v2698_v50  ;;  %v705_v2 = vcombine.high %v697_v45, %v697_v45  ;;  %v738_v3 = vrot.slane %v724_v54, %v2698_v50  ;;  %v775_v4 = vsel %vm774_vm8, %v697_v45, -inf }
 0x29e   :  { %v739_v5 = vcombine.high %v731_v60, %v731_v60  ;;  %v776_v6 = vrot.slane %v775_v4, 4  ;;  %v831_v7 = vsel %vm774_vm8, %v731_v60, -inf  ;;  %v755_v8 = vrot.slane %v741_v62, %v2698_v50 }
 0x29f   :  { %v706_v9 = vcombine.high %v2712_v1, %v2712_v1  ;;  %v740_v10 = vcombine.high %v738_v3, %v738_v3  ;;  %v782_v11 = vsel %vm774_vm8, %v705_v2, -inf  ;;  %v2723_v12 = vsel %vm774_vm8, %v2712_v1, -inf }
 0x2a0   :  { %v2725_v13 = vmax.f32 %v775_v4, %v776_v6  ;;  %v783_v14 = vrot.slane %v782_v11, 4  ;;  %v790_v15 = vrot.slane %v2723_v12, 4  ;;  %v832_v16 = vrot.slane %v831_v7, 4 }
 0x2a1   :  { %v838_v17 = vsel %vm774_vm8, %v739_v5, -inf  ;;  %v845_v18 = vsel %vm774_vm8, %v738_v3, -inf  ;;  %v756_v19 = vcombine.high %v748_v61, %v748_v61  ;;  %v757_v20 = vcombine.high %v755_v8, %v755_v8 }
 0x2a2   :  { %v778_v21 = vrot.slane %v2725_v13, 2  ;;  %v2731_v22 = vmax.f32 %v782_v11, %v783_v14  ;;  %v833_v23 = vmax.f32 %v831_v7, %v832_v16  ;;  %v839_v24 = vrot.slane %v838_v17, 4 }
 0x2a3   :  { %v846_v25 = vrot.slane %v845_v18, 4  ;;  %v852_v27 = vsel %vm774_vm8, %v740_v10, -inf  ;;  %v859_v28 = vsel %vm774_vm8, %v748_v61, -inf  ;;  %v866_v29 = vsel %vm774_vm8, %v756_v19, -inf }
 0x2a4   :  { %v834_v30 = vrot.slane %v833_v23, 2  ;;  %v840_v31 = vmax.f32 %v838_v17, %v839_v24  ;;  %v853_v32 = vrot.slane %v852_v27, 4  ;;  %v860_v33 = vrot.slane %v859_v28, 4 }
 0x2a5   :  { %v847_v34 = vmax.f32 %v845_v18, %v846_v25  ;;  %v867_v35 = vrot.slane %v866_v29, 4  ;;  %v873_v36 = vsel %vm774_vm8, %v755_v8, -inf  ;;  %v880_v38 = vsel %vm774_vm8, %v757_v20, -inf }
 0x2a6   :  { %v835_v39 = vmax.f32 %v833_v23, %v834_v30  ;;  %v841_v40 = vrot.slane %v840_v31, 2  ;;  %v854_v41 = vmax.f32 %v852_v27, %v853_v32  ;;  %v861_v42 = vmax.f32 %v859_v28, %v860_v33 }
 0x2a7   :  { %v848_v43 = vrot.slane %v847_v34, 2  ;;  %v868_v46 = vmax.f32 %v866_v29, %v867_v35  ;;  %v874_v47 = vrot.slane %v873_v36, 4  ;;  %v881_v48 = vrot.slane %v880_v38, 4 }
 0x2a8   :  { %v836_v49 = vrot.slane %v835_v39, 1  ;;  %v842_v51 = vmax.f32 %v840_v31, %v841_v40  ;;  %v855_v52 = vrot.slane %v854_v41, 2  ;;  %v862_v53 = vrot.slane %v861_v42, 2 }
 0x2a9   :  { %v849_v55 = vmax.f32 %v847_v34, %v848_v43  ;;  %v869_v56 = vrot.slane %v868_v46, 2  ;;  %v875_v58 = vmax.f32 %v873_v36, %v874_v47  ;;  %v882_v59 = vmax.f32 %v880_v38, %v881_v48 }
 0x2aa   :  { %v2738_v37 = vmax.f32 %v835_v39, %v836_v49  ;;  %v843_v45 = vrot.slane %v842_v51, 1  ;;  %v856_v54 = vmax.f32 %v854_v41, %v855_v52  ;;  %v863_v60 = vmax.f32 %v861_v42, %v862_v53 }
 0x2ab   :  { %v850_v61 = vrot.slane %v849_v55, 1  ;;  %v870_v62 = vmax.f32 %v868_v46, %v869_v56  ;;  %v876_v2 = vrot.slane %v875_v58, 2  ;;  %v883_v3 = vrot.slane %v882_v59, 2 }
 0x2ac   :  { %v2740_v4 = vmax.f32 %v842_v51, %v843_v45  ;;  %v857_v5 = vrot.slane %v856_v54, 1  ;;  %v864_v6 = vrot.slane %v863_v60, 1  ;;  %v721_v7 = vrot.slane %v707_v63, %v2698_v50 }
 0x2ad   :  { %v2746_v8 = vmax.f32 %v849_v55, %v850_v61  ;;  %v871_v10 = vrot.slane %v870_v62, 1  ;;  %v877_v11 = vmax.f32 %v875_v58, %v876_v2  ;;  %v884_v14 = vmax.f32 %v882_v59, %v883_v3  ;;  %v2305_v3 = vld [vmem:[#allocation10 + $0xa8] sm:$0xff]  }
 0x2ae   :  { %v2748_v16 = vmax.f32 %v856_v54, %v857_v5  ;;  %v2750_v17 = vmax.f32 %v863_v60, %v864_v6  ;;  %v917_v18 = vsel %vm903_vm9, %v2740_v4, %v2738_v37  ;;  %v722_v19 = vcombine.high %v2705_v44, %v2705_v44  ;;  %v2304_v54 = vld [vmem:[#allocation10 + $0x68] sm:$0xff]   ;;  %2231 = vmatpush3.bf16.msra.mxu0 %v2305_v3 }
 0x2af   :  { %v2757_v20 = vmax.f32 %v870_v62, %v871_v10  ;;  %v878_v57 = vrot.slane %v877_v11, 1  ;;  %v885_v63 = vrot.slane %v884_v14, 1  ;;  %v918_v23 = vsel %vm905_vm10, %v2746_v8, %v917_v18  ;;  %v2306_v5 = vld [vmem:[#allocation10 + $0x28] sm:$0xff]   ;;  %2097 = vmatprep.subr.bf16.mxu1 %v2304_v54  ;;  %2232 = vmatprep.subr.bf16.mxu0 %v2495_v0 }
 0x2b0   :  { %v919_v24 = vsel %vm907_vm11, %v2748_v16, %v918_v23  ;;  %v723_v25 = vcombine.high %v721_v7, %v721_v7  ;;  %v779_v27 = vmax.f32 %v2725_v13, %v778_v21  ;;  %v785_v28 = vrot.slane %v2731_v22, 2  ;;  %2098 = vmatpush3.bf16.msra.mxu1 %v2306_v5 }
 0x2b1   :  { %v2767_v29 = vmax.f32 %v877_v11, %v878_v57  ;;  %v2769_v30 = vmax.f32 %v884_v14, %v885_v63  ;;  %v920_v31 = vsel %vm909_vm12, %v2750_v17, %v919_v24  ;;  %v791_v32 = vmax.f32 %v2723_v12, %v790_v15  ;;  %v2307_v57 = vld [vmem:[#allocation10 + $0x60] sm:$0xff]  }
 0x2b2   :  { %v921_v33 = vsel %vm911_vm13, %v2757_v20, %v920_v31  ;;  %v780_v34 = vrot.slane %v779_v27, 1  ;;  %v786_v35 = vmax.f32 %v2731_v22, %v785_v28  ;;  %v796_v13 = vsel %vm774_vm8, %v706_v9, -inf  ;;  %v2309_v28 = vld [vmem:[#allocation10 + $0x20] sm:$0xff]   ;;  %2099 = vmatprep.subr.bf16.mxu1 %v2307_v57 }
 0x2b3   :  { %v922_v21 = vsel %vm913_vm14, %v2767_v29, %v921_v33  ;;  %v792_v36 = vrot.slane %v791_v32, 2  ;;  %v797_v38 = vrot.slane %v796_v13, 4  ;;  %v803_v39 = vsel %vm774_vm8, %v2705_v44, -inf }
 0x2b4   :  { %v923_v12 = vsel %vm915_vm15, %v2769_v30, %v922_v21  ;;  %v787_v15 = vrot.slane %v786_v35, 1  ;;  %v804_v40 = vrot.slane %v803_v39, 4  ;;  %v810_v9 = vsel %vm774_vm8, %v722_v19, -inf  ;;  %2100 = vmatpush3.bf16.msra.mxu1 %v2309_v28 }
 0x2b5   :  { %928 = vrot.lane.b32.xlu1 %v923_v12, %s2502_s3  ;;  %v793_v22 = vmax.f32 %v791_v32, %v792_v36  ;;  %v798_v1 = vmax.f32 %v796_v13, %v797_v38  ;;  %v817_v41 = vsel %vm774_vm8, %v721_v7, -inf  ;;  %v811_v46 = vrot.slane %v810_v9, 4  ;;  %v2310_v13 = vld [vmem:[#allocation10 + $0x58] sm:$0xff]  }
 0x2b6   :  { %v2792_v42 = vmax.f32 %v786_v35, %v787_v15  ;;  %v805_v43 = vmax.f32 %v803_v39, %v804_v40  ;;  %v818_v47 = vrot.slane %v817_v41, 4  ;;  %v2794_v44 = vmax.f32 %v779_v27, %v780_v34  ;;  %v2308_v27 = vld [vmem:[#allocation10 + $0xa0] sm:$0xff]   ;;  %v2311_v38 = vld [vmem:[#allocation10 + $0x98] sm:$0xff]   ;;  %2101 = vmatprep.subr.bf16.mxu1 %v2310_v13  ;;  %v2313_v40 = vld [vmem:[#allocation10 + $0x50] sm:$0xff]  }
 0x2b7   :  { %v794_v48 = vrot.slane %v793_v22, 1  ;;  %v799_v49 = vrot.slane %v798_v1, 2  ;;  %v824_v51 = vsel %vm774_vm8, %v723_v25, -inf  ;;  %v812_v53 = vmax.f32 %v810_v9, %v811_v46  ;;  %2233 = vmatpush3.bf16.msra.mxu0 %v2308_v27  ;;  %v2312_v39 = vld [vmem:[#allocation10 + $0x18] sm:$0xff]   ;;  %v2316_v9 = vld [vmem:[#allocation10 + $0x48] sm:$0xff]   ;;  %v2319_v46 = vld [vmem:[#allocation10 + $0x40] sm:$0xff]  }
 0x2b8   :  { %v806_v52 = vrot.slane %v805_v43, 2  ;;  %v819_v55 = vmax.f32 %v817_v41, %v818_v47  ;;  %v825_v56 = vrot.slane %v824_v51, 4  ;;  %v904_v45 = vsel %vm903_vm9, %v2792_v42, %v2794_v44  ;;  %2234 = vmatprep.subr.bf16.mxu0 %v2495_v0  ;;  %2102 = vmatpush3.bf16.msra.mxu1 %v2312_v39  ;;  %v2317_v41 = vld [vmem:[#allocation10 + $0x88] sm:$0xff]   ;;  %v2320_v47 = vld [vmem:[#allocation10 + $0x80] sm:$0xff]  }
 0x2b9   :  { %v2797_v58 = vmax.f32 %v793_v22, %v794_v48  ;;  %v800_v59 = vmax.f32 %v798_v1, %v799_v49  ;;  %v813_v61 = vrot.slane %v812_v53, 2  ;;  %v2314_v22 = vld [vmem:[#allocation10 + $0x90] sm:$0xff]   ;;  %2103 = vmatprep.subr.bf16.mxu1 %v2313_v40  ;;  %v2321_v48 = vld [vmem:[#allocation10] sm:$0xff]  }
 0x2ba   :  { %v807_v60 = vmax.f32 %v805_v43, %v806_v52  ;;  %v820_v62 = vrot.slane %v819_v55, 2  ;;  %v826_v2 = vmax.f32 %v824_v51, %v825_v56  ;;  %v2315_v1 = vld [vmem:[#allocation10 + $0x10] sm:$0xff]   ;;  %v2318_v43 = vld [vmem:[#allocation10 + $0x8] sm:$0xff]  }
 0x2bb   :  { %v801_v6 = vrot.slane %v800_v59, 1  ;;  %v906_v7 = vsel %vm905_vm10, %v2797_v58, %v904_v45  ;;  %v814_v11 = vmax.f32 %v812_v53, %v813_v61  ;;  %2235 = vmatpush3.bf16.msra.mxu0 %v2311_v38 }
 0x2bc   :  { %v808_v10 = vrot.slane %v807_v60, 1  ;;  %v821_v14 = vmax.f32 %v819_v55, %v820_v62  ;;  %v827_v18 = vrot.slane %v826_v2, 2  ;;  %2236 = vmatprep.subr.bf16.mxu0 %v2495_v0  ;;  %2104 = vmatpush3.bf16.msra.mxu1 %v2315_v1 }
 0x2bd   :  { %v2804_v19 = vmax.f32 %v800_v59, %v801_v6  ;;  %v815_v23 = vrot.slane %v814_v11, 1  ;;  %2105 = vmatprep.subr.bf16.mxu1 %v2316_v9 }
 0x2be   :  { %v2807_v63 = vmax.f32 %v807_v60, %v808_v10  ;;  %v822_v24 = vrot.slane %v821_v14, 1  ;;  %v828_v25 = vmax.f32 %v826_v2, %v827_v18 }
 0x2bf   :  { %v908_v31 = vsel %vm907_vm11, %v2804_v19, %v906_v7  ;;  %v2811_v32 = vmax.f32 %v814_v11, %v815_v23  ;;  %2237 = vmatpush3.bf16.msra.mxu0 %v2314_v22 }
 0x2c0   :  { %v829_v33 = vrot.slane %v828_v25, 1  ;;  %v910_v34 = vsel %vm909_vm12, %v2807_v63, %v908_v31  ;;  %v2815_v35 = vmax.f32 %v821_v14, %v822_v24  ;;  %2238 = vmatprep.subr.bf16.mxu0 %v2495_v0  ;;  %2106 = vmatpush3.bf16.msra.mxu1 %v2318_v43 }
 0x2c1   :  { %v912_v36 = vsel %vm911_vm13, %v2811_v32, %v910_v34  ;;  %2107 = vmatprep.subr.bf16.mxu1 %v2319_v46 }
 0x2c2   :  { %v2818_v21 = vmax.f32 %v828_v25, %v829_v33  ;;  %v914_v12 = vsel %vm913_vm14, %v2815_v35, %v912_v36 }
 0x2c3   :  { %2239 = vmatpush3.bf16.msra.mxu0 %v2317_v41 }
 0x2c4   :  { %v916_v15 = vsel %vm915_vm15, %v2818_v21, %v914_v12  ;;  %2240 = vmatprep.subr.bf16.mxu0 %v2495_v0  ;;  %2108 = vmatpush3.bf16.msra.mxu1 %v2321_v48 }
 0x2c5   :  { %926 = vrot.lane.b32.xlu0 %v916_v15, %s2502_s3 }
 0x2c7   :  { %2241 = vmatpush3.bf16.msra.mxu0 %v2320_v47 }
 0x327   :  { %v929_v49 = vpop.permute.xlu1 %928 }
 0x328   :  { %v939_v51 = vrot.slane %v929_v49, 1  ;;  %v940_v52 = vrot.slane %v929_v49, 2  ;;  %v941_v53 = vrot.slane %v929_v49, 3  ;;  %v942_v55 = vrot.slane %v929_v49, 4 }
 0x329   :  { %v943_v56 = vrot.slane %v929_v49, 5  ;;  %v944_v59 = vrot.slane %v929_v49, 6  ;;  %v945_v45 = vrot.slane %v929_v49, 7  ;;  %v970_v2 = vmax.f32 %v2738_v37, %v929_v49 }
 0x32a   :  { %v971_v54 = vmax.f32 %v2740_v4, %v939_v51  ;;  %v972_v60 = vmax.f32 %v2746_v8, %v940_v52  ;;  %v973_v61 = vmax.f32 %v2748_v16, %v941_v53  ;;  %v974_v62 = vmax.f32 %v2750_v17, %v942_v55 }
 0x32b   :  { %v975_v3 = vmax.f32 %v2757_v20, %v943_v56  ;;  %v976_v7 = vmax.f32 %v2767_v29, %v944_v59  ;;  %v977_v10 = vmax.f32 %v2769_v30, %v945_v45  ;;  %v2322_v59 = vld [vmem:[#allocation12 + $0x78] sm:$0xff]  }
 0x32c   :  { %v1012_v5 = vrot.slane %v971_v54, 7  ;;  %v1014_v6 = vrot.slane %v972_v60, 6  ;;  %v1016_v14 = vrot.slane %v973_v61, 5  ;;  %v1018_v8 = vrot.slane %v974_v62, 4  ;;  %v2323_v45 = vld [vmem:[#allocation12 + $0x38] sm:$0xff]   ;;  %v2326_v61 = vld [vmem:[#allocation12 + $0x70] sm:$0xff]   ;;  %2124 = vmatprep.subr.bf16.mxu1 %v2322_v59 }
 0x32d   :  { %v1020_v18 = vrot.slane %v975_v3, 3  ;;  %v1022_v37 = vrot.slane %v976_v7, 2  ;;  %v1024_v57 = vrot.slane %v977_v10, 1  ;;  %v2324_v54 = vld [vmem:[#allocation12 + $0xf8] sm:$0xff]   ;;  %v2328_v62 = vld [vmem:[#allocation12 + $0xf0] sm:$0xff]  }
 0x32e   :  { %v1013_v11 = vsel %vm903_vm9, %v1012_v5, %v970_v2  ;;  %v2325_v60 = vld [vmem:[#allocation12 + $0xb8] sm:$0xff]   ;;  %2146 = vmatprep.subr.bf16.mxu0 %v2324_v54  ;;  %v2327_v2 = vld [vmem:[#allocation12 + $0x30] sm:$0xff]   ;;  %v2330_v5 = vld [vmem:[#allocation12 + $0x68] sm:$0xff]  }
 0x32f   :  { %v1015_v4 = vsel %vm905_vm10, %v1014_v6, %v1013_v11  ;;  %v2329_v3 = vld [vmem:[#allocation12 + $0xb0] sm:$0xff]   ;;  %v2331_v6 = vld [vmem:[#allocation12 + $0x28] sm:$0xff]  }
 0x330   :  { %v1017_v16 = vsel %vm907_vm11, %v1016_v14, %v1015_v4  ;;  %v1976_v14 = vld [vmem:[%s2934_s7] ss:$0 sm:$0xff]  ;;  %s2503_s7 = smov 112  }
 0x331   :  { %v1019_v17 = vsel %vm909_vm12, %v1018_v8, %v1017_v16 }
 0x332   :  { %v1021_v20 = vsel %vm911_vm13, %v1020_v18, %v1019_v17 }
 0x333   :  { %v1023_v23 = vsel %vm913_vm14, %v1022_v37, %v1021_v20 }
 0x334   :  { %v1025_v29 = vsel %vm915_vm15, %v1024_v57, %v1023_v23 }
 0x335   :  { %1029 = vst [vmem:[#allocation3 + $0x11] sm:$0xff] %v1025_v29 }
 0x337   :  { %v927_v30 = vpop.permute.xlu0 %926 }
 0x338   :  { %v932_v24 = vrot.slane %v927_v30, 1  ;;  %v933_v25 = vrot.slane %v927_v30, 2  ;;  %v934_v27 = vrot.slane %v927_v30, 3  ;;  %v935_v28 = vrot.slane %v927_v30, 4 }
 0x339   :  { %v936_v31 = vrot.slane %v927_v30, 5  ;;  %v937_v33 = vrot.slane %v927_v30, 6  ;;  %v938_v34 = vrot.slane %v927_v30, 7  ;;  %v962_v12 = vmax.f32 %v2794_v44, %v927_v30 }
 0x33a   :  { %v963_v13 = vmax.f32 %v2792_v42, %v932_v24  ;;  %v964_v36 = vmax.f32 %v2797_v58, %v933_v25  ;;  %v965_v38 = vmax.f32 %v2804_v19, %v934_v27  ;;  %v966_v39 = vmax.f32 %v2807_v63, %v935_v28 }
 0x33b   :  { %v967_v15 = vmax.f32 %v2811_v32, %v936_v31  ;;  %v968_v1 = vmax.f32 %v2815_v35, %v937_v33  ;;  %v969_v9 = vmax.f32 %v2818_v21, %v938_v34 }
 0x33c   :  { %v998_v40 = vrot.slane %v963_v13, 7  ;;  %v1000_v22 = vrot.slane %v964_v36, 6  ;;  %v1002_v43 = vrot.slane %v965_v38, 5  ;;  %v1004_v58 = vrot.slane %v966_v39, 4  ;;  %v1035_v49 = vld [vmem:[#allocation3 + $0x12] sm:$0xff] }
 0x33d   :  { %v1006_v46 = vrot.slane %v967_v15, 3  ;;  %v1008_v44 = vrot.slane %v968_v1, 2  ;;  %v1010_v47 = vrot.slane %v969_v9, 1  ;;  %v1031_v51 = vld [vmem:[#allocation3 + $0x10] sm:$0xff] }
 0x33e   :  { %v999_v41 = vsel %vm903_vm9, %v998_v40, %v962_v12 }
 0x33f   :  { %v1001_v42 = vsel %vm905_vm10, %v1000_v22, %v999_v41 }
 0x340   :  { %v1003_v19 = vsel %vm907_vm11, %v1002_v43, %v1001_v42 }
 0x341   :  { %v1005_v63 = vsel %vm909_vm12, %v1004_v58, %v1003_v19 }
 0x342   :  { %v1007_v32 = vsel %vm911_vm13, %v1006_v46, %v1005_v63 }
 0x343   :  { %v1009_v48 = vsel %vm913_vm14, %v1008_v44, %v1007_v32 }
 0x344   :  { %v1011_v35 = vsel %vm915_vm15, %v1010_v47, %v1009_v48 }
 0x345   :  { %1028 = vst [vmem:[#allocation3 + $0x1] sm:$0xff] %v1011_v35  ;;  %v1037_v21 = vpack.c.bf16 %v1025_v29, %v1011_v35 }
 0x347   :  { %1270 = vmatprep.mubr.bf16.mxu1 %v1037_v21 }
 0x34c   :  { %v1034_v52 = vld [vmem:[#allocation3 + $0x2] sm:$0xff] }
 0x34d   :  { %v1030_v53 = vld [vmem:[#allocation3] sm:$0xff]  ;;  %v1038_v55 = vpack.c.bf16 %v1035_v49, %v1034_v52 }
 0x34e   :  { %v1036_v56 = vpack.c.bf16 %v1031_v51, %v1030_v53 }
 0x34f   :  { %2243 = vmatmul.mubr.bf16.vlgmr.msra.gmra.mxu0 %v1038_v55 }
 0x350   :  { %1271 = vmatmul.mubr.bf16.vlgmr.msra.gmra.mxu1 %v1036_v56  ;;  %2147 = vmatpush3.bf16.msra.mxu0 %v2325_v60 }
 0x351   :  { %2125 = vmatpush3.bf16.msra.mxu1 %v2323_v45  ;;  %2148 = vmatprep.subr.bf16.mxu0 %v2328_v62 }
 0x352   :  { %2126 = vmatprep.subr.bf16.mxu1 %v2326_v61 }
 0x354   :  { %2149 = vmatpush3.bf16.msra.mxu0 %v2329_v3 }
 0x355   :  { %2127 = vmatpush3.bf16.msra.mxu1 %v2327_v2 }
 0x356   :  { %2128 = vmatprep.subr.bf16.mxu1 %v2330_v5 }
 0x359   :  { %2129 = vmatpush3.bf16.msra.mxu1 %v2331_v6  ;;  %v2332_v6 = vld [vmem:[#allocation12 + $0xe8] sm:$0xff]  }
 0x35a   :  { %2150 = vmatprep.subr.bf16.mxu0 %v2332_v6 }
 0x40f   :  { %v1313_v7 = vpop.f32.mrf.mxu0 }
 0x410   :  { %v2109_v10 = vpop.f32.mrf.mxu1 }
 0x411   :  { %v2244_v11 = vpop.f32.mrf.mxu0 }
 0x412   :  { %v2110_v4 = vpop.f32.mrf.mxu1 }
 0x413   :  { %v2111_v8 = vadd.f32 %v2110_v4, %v2109_v10  ;;  %v1316_v16 = vpop.f32.mrf.mxu0  ;;  %v2333_v4 = vld [vmem:[#allocation12 + $0xa8] sm:$0xff]  }
 0x414   :  { %v2112_v18 = vpop.f32.mrf.mxu1  ;;  %2151 = vmatpush3.bf16.msra.mxu0 %v2333_v4 }
 0x415   :  { %v1273_v17 = vadd.f32 %v2111_v8, %v1976_v14  ;;  %v2245_v37 = vpop.f32.mrf.mxu0 }
 0x416   :  { %v2113_v20 = vpop.f32.mrf.mxu1  ;;  %v2334_v37 = vld [vmem:[#allocation12 + $0x60] sm:$0xff]  }
 0x417   :  { %v1314_v57 = vadd.f32 %v1313_v7, %v1273_v17  ;;  %v2114_v23 = vadd.f32 %v2113_v20, %v2112_v18  ;;  %2130 = vmatprep.subr.bf16.mxu1 %v2334_v37 }
 0x419   :  { %v1320_v29 = vmax.f32 %v1314_v57, 0.0  ;;  %v1276_v30 = vadd.f32 %v2114_v23, %v1976_v14 }
 0x41b   :  { %v1324_v24 = vcombine.high %v1320_v29, %v1320_v29  ;;  %v1331_v25 = vrot.slane %v1320_v29, %v2698_v50  ;;  %v1317_v27 = vadd.f32 %v1316_v16, %v1276_v30  ;;  %v2335_v30 = vld [vmem:[#allocation12 + $0x20] sm:$0xff]  }
 0x41c   :  { %2131 = vmatpush3.bf16.msra.mxu1 %v2335_v30 }
 0x41d   :  { %v1338_v28 = vrot.slane %v1324_v24, %v2698_v50  ;;  %v1339_v31 = vcombine.high %v1331_v25, %v1331_v25  ;;  %v1366_v33 = vsel %vm774_vm8, %v1331_v25, -inf  ;;  %v1321_v34 = vmax.f32 %v1317_v27, 0.0  ;;  %v2336_v27 = vld [vmem:[#allocation12 + $0xe0] sm:$0xff]  }
 0x41e   :  { %v1367_v13 = vrot.slane %v1366_v33, 4  ;;  %2152 = vmatprep.subr.bf16.mxu0 %v2336_v27 }
 0x41f   :  { %v1340_v36 = vcombine.high %v1338_v28, %v1338_v28  ;;  %v1373_v38 = vsel %vm774_vm8, %v1339_v31, -inf  ;;  %v1380_v39 = vsel %vm774_vm8, %v1338_v28, -inf  ;;  %v1341_v12 = vcombine.high %v1321_v34, %v1321_v34 }
 0x420   :  { %v1368_v15 = vmax.f32 %v1366_v33, %v1367_v13  ;;  %v1374_v40 = vrot.slane %v1373_v38, 4  ;;  %v1381_v22 = vrot.slane %v1380_v39, 4  ;;  %v1348_v1 = vrot.slane %v1321_v34, %v2698_v50  ;;  %v2337_v13 = vld [vmem:[#allocation12 + $0xa0] sm:$0xff]  }
 0x421   :  { %v1387_v9 = vsel %vm774_vm8, %v1340_v36, -inf  ;;  %v1355_v41 = vrot.slane %v1341_v12, %v2698_v50  ;;  %2153 = vmatpush3.bf16.msra.mxu0 %v2337_v13 }
 0x422   :  { %v1369_v43 = vrot.slane %v1368_v15, 2  ;;  %v1375_v42 = vmax.f32 %v1373_v38, %v1374_v40  ;;  %v1382_v58 = vmax.f32 %v1380_v39, %v1381_v22  ;;  %v1388_v19 = vrot.slane %v1387_v9, 4  ;;  %v2338_v38 = vld [vmem:[#allocation12 + $0x58] sm:$0xff]  }
 0x423   :  { %v1356_v46 = vcombine.high %v1348_v1, %v1348_v1  ;;  %v1357_v63 = vcombine.high %v1355_v41, %v1355_v41  ;;  %v1394_v44 = vsel %vm774_vm8, %v1348_v1, -inf  ;;  %v1408_v32 = vsel %vm774_vm8, %v1355_v41, -inf  ;;  %v2339_v40 = vld [vmem:[#allocation12 + $0x18] sm:$0xff]   ;;  %2132 = vmatprep.subr.bf16.mxu1 %v2338_v38 }
 0x424   :  { %v1370_v47 = vmax.f32 %v1368_v15, %v1369_v43  ;;  %v1376_v48 = vrot.slane %v1375_v42, 2  ;;  %v1383_v35 = vrot.slane %v1382_v58, 2  ;;  %v1389_v21 = vmax.f32 %v1387_v9, %v1388_v19  ;;  %v2340_v22 = vld [vmem:[#allocation12 + $0xd8] sm:$0xff]   ;;  %v2342_v43 = vld [vmem:[#allocation12 + $0x50] sm:$0xff]   ;;  %2133 = vmatpush3.bf16.msra.mxu1 %v2339_v40 }
 0x425   :  { %v1395_v49 = vrot.slane %v1394_v44, 4  ;;  %v1401_v51 = vsel %vm774_vm8, %v1356_v46, -inf  ;;  %v1409_v52 = vrot.slane %v1408_v32, 4  ;;  %v1415_v53 = vsel %vm774_vm8, %v1357_v63, -inf  ;;  %v2341_v1 = vld [vmem:[#allocation12 + $0x98] sm:$0xff]   ;;  %2154 = vmatprep.subr.bf16.mxu0 %v2340_v22  ;;  %v2343_v63 = vld [vmem:[#allocation12 + $0x10] sm:$0xff]   ;;  %2134 = vmatprep.subr.bf16.mxu1 %v2342_v43 }
 0x426   :  { %v1371_v55 = vrot.slane %v1370_v47, 1  ;;  %v1377_v56 = vmax.f32 %v1375_v42, %v1376_v48  ;;  %v1384_v59 = vmax.f32 %v1382_v58, %v1383_v35  ;;  %v1390_v45 = vrot.slane %v1389_v21, 2  ;;  %v2344_v42 = vld [vmem:[#allocation12 + $0xd0] sm:$0xff]   ;;  %2155 = vmatpush3.bf16.msra.mxu0 %v2341_v1  ;;  %v2348_v35 = vld [vmem:[#allocation12 + $0xc8] sm:$0xff]   ;;  %v2354_v43 = vld [vmem:[%s2937_s10 + $0x8] sm:$0xff]  }
 0x427   :  { %v1396_v54 = vmax.f32 %v1394_v44, %v1395_v49  ;;  %v1402_v60 = vrot.slane %v1401_v51, 4  ;;  %v1410_v61 = vmax.f32 %v1408_v32, %v1409_v52  ;;  %v1416_v62 = vrot.slane %v1415_v53, 4  ;;  %v2346_v44 = vld [vmem:[#allocation12 + $0x48] sm:$0xff]   ;;  %2156 = vmatprep.subr.bf16.mxu0 %v2344_v42 }
 0x428   :  { %v1378_v2 = vrot.slane %v1377_v56, 1  ;;  %v1385_v3 = vrot.slane %v1384_v59, 1  ;;  %v1391_v5 = vmax.f32 %v1389_v21, %v1390_v45  ;;  %v2875_v8 = vmax.f32 %v1370_v47, %v1371_v55  ;;  %v2345_v47 = vld [vmem:[#allocation12 + $0x90] sm:$0xff]   ;;  %2135 = vmatpush3.bf16.msra.mxu1 %v2343_v63  ;;  %v2347_v49 = vld [vmem:[#allocation12 + $0x8] sm:$0xff]   ;;  %v2351_v55 = vld [vmem:[#allocation12] sm:$0xff]  }
 0x429   :  { %v1397_v7 = vrot.slane %v1396_v54, 2  ;;  %v1403_v10 = vmax.f32 %v1401_v51, %v1402_v60  ;;  %v1411_v11 = vrot.slane %v1410_v61, 2  ;;  %v1417_v14 = vmax.f32 %v1415_v53, %v1416_v62  ;;  %2136 = vmatprep.subr.bf16.mxu1 %v2346_v44  ;;  %v2350_v51 = vld [vmem:[#allocation12 + $0x40] sm:$0xff]   ;;  %v2349_v52 = vld [vmem:[#allocation12 + $0x88] sm:$0xff]  }
 0x42a   :  { %v2877_v16 = vmax.f32 %v1377_v56, %v1378_v2  ;;  %v2879_v18 = vmax.f32 %v1384_v59, %v1385_v3  ;;  %v1392_v17 = vrot.slane %v1391_v5, 1  ;;  %2157 = vmatpush3.bf16.msra.mxu0 %v2345_v47  ;;  %v2352_v53 = vld [vmem:[#allocation12 + $0xc0] sm:$0xff]   ;;  %v2504_v3 = vmov 1935823168  }
 0x42b   :  { %v1398_v20 = vmax.f32 %v1396_v54, %v1397_v7  ;;  %v1404_v57 = vrot.slane %v1403_v10, 2  ;;  %v1412_v23 = vmax.f32 %v1410_v61, %v1411_v11  ;;  %v1418_v29 = vrot.slane %v1417_v14, 2  ;;  %2158 = vmatprep.subr.bf16.mxu0 %v2348_v35  ;;  %v2353_v56 = vld [vmem:[#allocation12 + $0x80] sm:$0xff]  }
 0x42c   :  { %v2881_v24 = vmax.f32 %v1391_v5, %v1392_v17  ;;  %v1430_v25 = vsel %vm903_vm9, %v2877_v16, %v2875_v8  ;;  %2137 = vmatpush3.bf16.msra.mxu1 %v2347_v49  ;;  %v1488_v5 = vunpack.c.l.s4 %v2504_v3 }
 0x42d   :  { %v1399_v28 = vrot.slane %v1398_v20, 1  ;;  %v1405_v31 = vmax.f32 %v1403_v10, %v1404_v57  ;;  %v1413_v33 = vrot.slane %v1412_v23, 1  ;;  %v1419_v34 = vmax.f32 %v1417_v14, %v1418_v29  ;;  %2138 = vmatprep.subr.bf16.mxu1 %v2350_v51 }
 0x42e   :  { %v1431_v36 = vsel %vm905_vm10, %v2879_v18, %v1430_v25  ;;  %2159 = vmatpush3.bf16.msra.mxu0 %v2349_v52 }
 0x42f   :  { %v1400_v39 = vmax.f32 %v1398_v20, %v1399_v28  ;;  %v1406_v12 = vrot.slane %v1405_v31, 1  ;;  %v1420_v15 = vrot.slane %v1419_v34, 1  ;;  %v1414_v9 = vmax.f32 %v1412_v23, %v1413_v33  ;;  %2160 = vmatprep.subr.bf16.mxu0 %v2352_v53  ;;  %v2034_v53 = vld [vmem:[%s2938_s11] ss:$0 sm:$0xff] }
 0x430   :  { %v1432_v41 = vsel %vm907_vm11, %v2881_v24, %v1431_v36  ;;  %2139 = vmatpush3.bf16.msra.mxu1 %v2351_v55  ;;  %v1489_v23 = vunpack.c.0.s8 %v1488_v5 }
 0x431   :  { %v1407_v58 = vmax.f32 %v1405_v31, %v1406_v12  ;;  %v1421_v19 = vmax.f32 %v1419_v34, %v1420_v15  ;;  %v1433_v46 = vsel %vm909_vm12, %v1400_v39, %v1432_v41  ;;  %2246 = vmatprep.subr.bf16.mxu1 %v2495_v0 }
 0x432   :  { %2161 = vmatpush3.bf16.msra.mxu0 %v2353_v56 }
 0x433   :  { %v1434_v32 = vsel %vm911_vm13, %v1407_v58, %v1433_v46 }
 0x434   :  { %v1435_v48 = vsel %vm913_vm14, %v1414_v9, %v1434_v32 }
 0x435   :  { %v1436_v21 = vsel %vm915_vm15, %v1421_v19, %v1435_v48 }
 0x436   :  { %1438 = vrot.lane.b32.xlu0 %v1436_v21, %s2503_s7 }
 0x4a8   :  { %v1439_v59 = vpop.permute.xlu0 %1438 }
 0x4a9   :  { %v1441_v45 = vrot.slane %v1439_v59, 1  ;;  %v1442_v54 = vrot.slane %v1439_v59, 2  ;;  %v1443_v60 = vrot.slane %v1439_v59, 3  ;;  %v1444_v61 = vrot.slane %v1439_v59, 4 }
 0x4aa   :  { %v1445_v62 = vrot.slane %v1439_v59, 5  ;;  %v1446_v2 = vrot.slane %v1439_v59, 6  ;;  %v1447_v6 = vrot.slane %v1439_v59, 7  ;;  %v1456_v4 = vmax.f32 %v2875_v8, %v1439_v59 }
 0x4ab   :  { %v1457_v7 = vmax.f32 %v2877_v16, %v1441_v45  ;;  %v1458_v10 = vmax.f32 %v2879_v18, %v1442_v54  ;;  %v1459_v11 = vmax.f32 %v2881_v24, %v1443_v60  ;;  %v1460_v14 = vmax.f32 %v1400_v39, %v1444_v61 }
 0x4ac   :  { %v1461_v17 = vmax.f32 %v1407_v58, %v1445_v62  ;;  %v1462_v57 = vmax.f32 %v1414_v9, %v1446_v2  ;;  %v1463_v25 = vmax.f32 %v1421_v19, %v1447_v6  ;;  %v1492_v8 = vsub.s32 %v1489_v23, %v2683_v26  ;;  %v2001_v58 = vld [vmem:[%s2936_s9] ss:$0 sm:$0xff]  ;;  %s2505_s9 = smov [#allocation13]  }
 0x4ad   :  { %v1472_v37 = vrot.slane %v1457_v7, 7  ;;  %v1474_v20 = vrot.slane %v1458_v10, 6  ;;  %v1476_v30 = vrot.slane %v1459_v11, 5  ;;  %v1478_v27 = vrot.slane %v1460_v14, 4  ;;  %s1940_s26 = sshll.u32 %s2505_s9, 4  ;;  %s1941_s26 = int_to_ptr.vmem [resolvable:$true] %s1940_s26 }
 0x4ae   :  { %v1480_v16 = vrot.slane %v1461_v17, 3  ;;  %v1482_v31 = vrot.slane %v1462_v57, 2  ;;  %v1484_v34 = vrot.slane %v1463_v25, 1  ;;  %s2458_s6 = scalar_lea.vmem %s1941_s26, 32  ;;  %p2463_p12 = scmp.lt.s32.totalorder %s1941_s26, %s1941_s26 }
 0x4af   :  { %v1473_v29 = vsel %vm903_vm9, %v1472_v37, %v1456_v4  ;;  %p2459_p11 = scmp.ne.s32.totalorder %s1941_s26, %s2458_s6  ;;  %p2464_p13 = scmp.lt.s32.totalorder %s2458_s6, %s2458_s6 }
 0x4b0   :  { %v1475_v28 = vsel %vm905_vm10, %v1474_v20, %v1473_v29 }
 0x4b1   :  { %v1477_v18 = vsel %vm907_vm11, %v1476_v30, %v1475_v28  ;;  %p2465_p0 = por %p2464_p13, %p2463_p12 }
 0x4b2   :  { %v1479_v24 = vsel %vm909_vm12, %v1478_v27, %v1477_v18 }
 0x4b3   :  { %v1481_v33 = vsel %vm911_vm13, %v1480_v16, %v1479_v24  ;;  %p2466_p1 = pnand %p2465_p0, %p2459_p11 }
 0x4b4   :  { %v1483_v13 = vsel %vm913_vm14, %v1482_v31, %v1481_v33 }
 0x4b5   :  { %v1485_v36 = vsel %vm915_vm15, %v1484_v34, %v1483_v13 }
 0x4b6   :  { %v1493_v38 = vrot.slane %v1485_v36, %v1492_v8 }
 0x4b8   :  { %v1502_v39 = vrot.slane %v1493_v38, %v2698_v50  ;;  %v1495_v12 = vcombine.high %v1493_v38, %v1493_v38 }
 0x4ba   :  { %v1510_v15 = vcombine.high %v1502_v39, %v1502_v39  ;;  %v1509_v40 = vrot.slane %v1495_v12, %v2698_v50  ;;  %v1516_v9 = vpack.c.bf16 %v1502_v39, %v1502_v39  ;;  %v2355_v50 = vld [vmem:[%s2937_s10] sm:$0xff]  }
 0x4bc   :  { %v1517_v22 = vpack.c.bf16 %v1510_v15, %v1510_v15  ;;  %v1511_v1 = vcombine.high %v1509_v40, %v1509_v40  ;;  %v1518_v26 = vpack.c.bf16 %v1509_v40, %v1509_v40 }
 0x4be   :  { %1815 = vmatprep.mubr.bf16.mxu1 %v1517_v22  ;;  %v1519_v41 = vpack.c.bf16 %v1511_v1, %v1511_v1 }
 0x4bf   :  { %1816 = vmatmul.mubr.bf16.vlgmr.msra.gmra.mxu1 %v1516_v9 }
 0x4c0   :  { %1855 = vmatprep.mubr.bf16.mxu0 %v1519_v41  ;;  %2250 = vmatprep.mubr.msk.bf16.mxu1 %vm2499_vm6, %v2495_v0 }
 0x4c1   :  { %1856 = vmatmul.mubr.bf16.vlgmr.msra.gmra.mxu0 %v1518_v26  ;;  %2247 = vmatpush3.bf16.msra.mxu1 %v2354_v43 }
 0x4c2   :  { %2248 = vmatprep.subr.bf16.mxu1 %v2495_v0 }
 0x4c5   :  { %2249 = vmatpush3.bf16.msra.mxu1 %v2355_v50 }
 0x57f   :  { %v2140_v42 = vpop.f32.mrf.mxu1 }
 0x581   :  { %v2141_v19 = vpop.f32.mrf.mxu1  ;;  %v2162_v46 = vpop.f32.mrf.mxu0 }
 0x582   :  { %v2142_v63 = vadd.f32 %v2141_v19, %v2140_v42 }
 0x583   :  { %v2143_v44 = vpop.f32.mrf.mxu1  ;;  %v2163_v32 = vpop.f32.mrf.mxu0 }
 0x584   :  { %v1818_v47 = vadd.f32 %v2142_v63, %v2001_v58  ;;  %v2164_v48 = vadd.f32 %v2163_v32, %v2162_v46 }
 0x585   :  { %v2144_v35 = vpop.f32.mrf.mxu1  ;;  %v2165_v21 = vpop.f32.mrf.mxu0 }
 0x586   :  { %v1858_v0 = vadd.f32 %v2164_v48, %v1818_v47 }
 0x587   :  { %v2166_v49 = vpop.f32.mrf.mxu0 }
 0x588   :  { %v1863_v51 = vmax.f32 %v1858_v0, 0.0 }
 0x58a   :  { %v1864_v52 = vpack.c.bf16 %v1863_v51, %v1863_v51 }
 0x58c   :  { %2251 = vmatmul.mubr.msk.bf16.vlgmr.msra.gmra.mxu1 %vm1888_vm0, %v1864_v52 }
 0x64c   :  { %v1926_v55 = vpop.f32.mrf.mxu1 }
 0x64d   :  { %v1927_v56 = vadd.f32 %v2034_v53, %v1926_v55 }
 0x64e   :  { %v2252_v59 = vpop.f32.mrf.mxu1 }
 0x64f   :  { %1933 = vst.msk [vmem:[#allocation13] sm:$0x3] %vm1932_vm1, %v1927_v56 }
 0x650   :  { %v1929_v45 = vpop.f32.mrf.mxu1 }
 0x651   :  { %2469 = shalt.err (!%p2466_p1)
}
 0x652   :  { %1943 = dma.vmem_to_hbm [thread:$0]  %s1941_s26, 32, %s2939_s12, [#allocation6]   ;;  %v2253_v54 = vpop.f32.mrf.mxu1 }
 0x653   :  { %2484 = dma.done.wait [#allocation6], 32  }
 0x654   :  { %2485 = vsyncadd [#allocation6], 4294967264 }
 0x655   :  { %1947 = vsyncpa [#allocation5], 1 }
 0x656   :  { %1948 = vsyncpa [#allocation8], 1 }
 0x657   :  { %1949 = vsyncpa [#allocation11], 1 }
 0x658   :  { %1950 = vsyncpa [#allocation6], 1 }

</bundles_post_ra>
